<compile_context>
chip_gen: v7x
topology: tpu7x:2x2x1
jax: 0.10.0
libtpu: 0.0.40
codegen_flags: <defaults>
</compile_context>

<pallas_src>
import jax
import jax.numpy as jnp
from jax import lax
from jax.experimental import pallas as pl
from jax.experimental.pallas import tpu as pltpu

KSIZE = 7
PAD = 3


def _sigmoid(z):
    # exp and the approximate reciprocal both land on the EUP slot.
    return pl.reciprocal(1.0 + jnp.exp(-z), approx=True)


def cbam_kernel(x_ref, w1t_ref, w2t_ref, m_ref, o_ref):
    Bb, C, HW = x_ref.shape
    xf = x_ref[...].astype(jnp.float32)                       # (Bb, C, HW) lane-dense

    # ---------------- Channel attention (block-wide, no per-sample loop) ----
    avg_bc = jnp.mean(xf, axis=2)                             # (Bb, C)
    max_bc = jnp.max(xf, axis=2)                              # (Bb, C)
    stats = jnp.concatenate([avg_bc, max_bc], axis=0)         # (2*Bb, C)

    w1t = w1t_ref[...].astype(jnp.float32)                    # (C, Cr)
    w2t = w2t_ref[...].astype(jnp.float32)                    # (Cr, C)
    h = jnp.maximum(
        jnp.dot(stats, w1t, preferred_element_type=jnp.float32), 0.0)   # (2*Bb, Cr)
    fc = jnp.dot(h, w2t, preferred_element_type=jnp.float32)            # (2*Bb, C)
    ca = _sigmoid(fc[:Bb] + fc[Bb:])                          # (Bb, C)

    # Apply channel attention once; x1 stays live (VMEM) and is reused below.
    x1 = xf * ca[:, :, None]                                  # (Bb, C, HW)

    # ------------- Spatial attention: pooled maps, 7x7 conv as one matmul ---
    avg_sp = jnp.mean(x1, axis=1)                             # (Bb, HW)
    max_sp = jnp.max(x1, axis=1)                              # (Bb, HW)
    cat = jnp.concatenate([avg_sp, max_sp], axis=1)           # (Bb, 2*HW), lane-aligned
    conv = jnp.dot(cat.astype(m_ref.dtype), m_ref[...],
                   preferred_element_type=jnp.float32)        # (Bb, HW) on the MXU
    sa = _sigmoid(conv)                                       # (Bb, HW)

    # ---------------- Apply spatial attention; single lane-dense store ------
    o_ref[...] = (x1 * sa[:, None, :]).astype(o_ref.dtype)


def _spatial_conv_matrix(w_sp, H, W):
    """Build the (2*H*W, H*W) Toeplitz matrix M so that the 7x7 padded conv of
    the concatenated [avg, max] maps equals cat_flat @ M (zero padding folded in)."""
    HW = H * W
    w = jnp.asarray(w_sp, jnp.float32).reshape(2, KSIZE, KSIZE)
    p = jnp.arange(HW)
    y = p // W
    x = p % W
    dy = y[:, None] - y[None, :] + PAD          # (p_in, p_out)
    dx = x[:, None] - x[None, :] + PAD
    valid = (dy >= 0) & (dy < KSIZE) & (dx >= 0) & (dx < KSIZE)
    dyc = jnp.clip(dy, 0, KSIZE - 1)
    dxc = jnp.clip(dx, 0, KSIZE - 1)
    blocks = [jnp.where(valid, w[c][dyc, dxc], jnp.float32(0.0)) for c in range(2)]
    return jnp.concatenate(blocks, axis=0)      # (2*HW, HW) f32


def _tensorcores_per_chip():
    """Best-effort detection of chips whose 'parallel' grid axes are sharded
    across 2 TensorCores (v4 / v5p megacore, v7x). Fallback: 1 (v5e/v6e)."""
    try:
        kind = jax.devices()[0].device_kind.lower()
    except Exception:
        return 1
    if any(tag in kind for tag in ("v4", "v5p", "v7", "7x")):
        return 2
    return 1


def _pick_block_b(B, C, HW, itemsize, n_cores, budget_bytes=12 * 1024 * 1024):
    """Choose the batch block.

    2-core chips: prefer an even grid of >= 4 steps so both TensorCores get
    pipelined work.  Single-core chips: the kernel is per-step-overhead-bound
    at this size, so take the largest block that fits the scoped-VMEM budget.
    """
    m_bytes = 2 * (2 * HW) * HW * 2             # bf16 Toeplitz, double-buffered
    per_sample = 2 * C * HW * itemsize          # one input + one output sample

    def fits(bb):
        io = 2 * bb * per_sample                # in/out blocks, double-buffered
        live = 2 * bb * C * HW * 4              # xf + x1 kept live in f32
        return m_bytes + io + live <= budget_bytes

    divisors = [d for d in range(1, B + 1) if B % d == 0 and fits(d)]
    if not divisors:
        return 1
    if n_cores >= 2:
        for pred in (lambda d: B // d >= 4 and (B // d) % 2 == 0,
                     lambda d: B // d >= 2 and (B // d) % 2 == 0,
                     lambda d: True):
            good = [d for d in divisors if pred(d)]
            if good:
                return max(good)
    return max(divisors)


def cbam(x, w1, w2, w_sp, *, block_b=None):
    """x: (B, C, H, W); w1: (C//r, C); w2: (C, C//r); w_sp: (1, 2, 7, 7)."""
    B, C, H, W = x.shape
    Cr = w1.shape[0]
    HW = H * W

    # TODO(synk): for large H*W the O(HW^2) Toeplitz matrix blows past VMEM
    # (e.g. 64x64 -> 64 MiB bf16); fall back to a direct 49-tap conv built
    # from pltpu.roll shifts + MACs instead of this matmul formulation.
    if (2 * HW) * HW * 2 > 8 * 1024 * 1024:
        raise NotImplementedError("spatial size too large for the Toeplitz-matmul path")

    n_cores = _tensorcores_per_chip()
    if block_b is None:
        block_b = _pick_block_b(B, C, HW, x.dtype.itemsize, n_cores)
    assert B % block_b == 0, (B, block_b)

    x_flat = x.reshape(B, C, HW)                              # HW on the lane axis
    conv_m = _spatial_conv_matrix(w_sp, H, W).astype(jnp.bfloat16)   # (2*HW, HW) bf16
    w1_t = jnp.asarray(w1, jnp.float32).T                     # (C, Cr)
    w2_t = jnp.asarray(w2, jnp.float32).T                     # (Cr, C)

    out_flat = pl.pallas_call(
        cbam_kernel,
        out_shape=jax.ShapeDtypeStruct((B, C, HW), x.dtype),
        grid_spec=pltpu.PrefetchScalarGridSpec(
            num_scalar_prefetch=0,
            grid=(B // block_b,),
            in_specs=[
                pl.BlockSpec((block_b, C, HW), lambda b: (b, 0, 0)),
                pl.BlockSpec((C, Cr), lambda b: (0, 0)),
                pl.BlockSpec((Cr, C), lambda b: (0, 0)),
                pl.BlockSpec((2 * HW, HW), lambda b: (0, 0)),
            ],
            out_specs=pl.BlockSpec((block_b, C, HW), lambda b: (b, 0, 0)),
        ),
        compiler_params=pltpu.CompilerParams(
            dimension_semantics=("parallel",)),
    )(x_flat, w1_t, w2_t, conv_m)
    return out_flat.reshape(B, C, H, W)


def cbam_ref(x, w1, w2, w_sp):
    """Pure-JAX reference mirroring the PyTorch CBAM forward (f32)."""
    avg = jnp.mean(x, axis=(2, 3), keepdims=True)
    mx = jnp.max(x, axis=(2, 3), keepdims=True)

    def fc(v):                                   # v: (B, C, 1, 1)
        v2 = v[:, :, 0, 0]                       # (B, C)
        h = jnp.maximum(v2 @ w1.T, 0.0)          # (B, Cr)
        o = h @ w2.T                             # (B, C)
        return o[:, :, None, None]

    ca = jax.nn.sigmoid(fc(avg) + fc(mx))
    x1 = x * ca
    avg_sp = jnp.mean(x1, axis=1, keepdims=True)
    max_sp = jnp.max(x1, axis=1, keepdims=True)
    cat = jnp.concatenate([avg_sp, max_sp], axis=1)       # (B, 2, H, W)
    conv = lax.conv_general_dilated(
        cat, w_sp, window_strides=(1, 1), padding=((PAD, PAD), (PAD, PAD)),
        dimension_numbers=("NCHW", "OIHW", "NCHW"))
    sa = jax.nn.sigmoid(conv)
    return x1 * sa


if __name__ == "__main__":
    key = jax.random.PRNGKey(0)
    B, C, H, W = 8, 32, 16, 16
    reduction = 16
    Cr = C // reduction  # = 2

    k1, k2, k3, k4 = jax.random.split(key, 4)
    x = jax.random.normal(k1, (B, C, H, W), jnp.float32)
    # Deterministic synthetic weights (shapes from the module's __init__):
    w1 = jax.random.normal(k2, (Cr, C), jnp.float32) * 0.1       # Conv2d(C, C//r, 1, bias=False)
    w2 = jax.random.normal(k3, (C, Cr), jnp.float32) * 0.1       # Conv2d(C//r, C, 1, bias=False)
    w_sp = jax.random.normal(k4, (1, 2, KSIZE, KSIZE), jnp.float32) * 0.1  # Conv2d(2, 1, 7, pad=3)

    out = cbam(x, w1, w2, w_sp)
    jax.block_until_ready(out)

    ref = cbam_ref(x, w1, w2, w_sp)
    assert out.shape == x.shape and out.dtype == x.dtype
    max_err = float(jnp.max(jnp.abs(out - ref)))
    # bf16 MXU operands for the 7x7 conv + approx-reciprocal sigmoids dominate
    # the tolerance vs. the f32 reference.
    if max_err > 5e-2:
        raise SystemExit(f"mismatch vs reference: max_err={max_err}")

    print("KERNEL_OK")
</pallas_src>

<mosaic_0001>
module attributes {stable_mosaic.version = 11 : i64} {
  func.func @cbam_kernel(%arg0: i32, %arg1: memref<8x32x256xf32, #tpu.memory_space<vmem>>, %arg2: memref<32x2xf32, #tpu.memory_space<vmem>>, %arg3: memref<2x32xf32, #tpu.memory_space<vmem>>, %arg4: memref<512x256xbf16, #tpu.memory_space<vmem>>, %arg5: memref<8x32x256xf32, #tpu.memory_space<vmem>>) attributes {dimension_semantics = [#tpu.dimension_semantics<parallel>], iteration_bounds = array<i64: 1>, scalar_prefetch = 0 : i64, scratch_operands = 0 : i64, tpu.core_type = #tpu.core_type<tc>, window_params = [{transform_indices = @transform_0, window_bounds = array<i64: 8, 32, 256>}, {pipeline_mode = #tpu.pipeline_mode<synchronous>, transform_indices = @transform_1, window_bounds = array<i64: 32, 2>}, {pipeline_mode = #tpu.pipeline_mode<synchronous>, transform_indices = @transform_2, window_bounds = array<i64: 2, 32>}, {pipeline_mode = #tpu.pipeline_mode<synchronous>, transform_indices = @transform_3, window_bounds = array<i64: 512, 256>}, {transform_indices = @transform_4, window_bounds = array<i64: 8, 32, 256>}]} {
    %c0 = arith.constant 0 : index
    %c0_0 = arith.constant 0 : index
    %c0_1 = arith.constant 0 : index
    %0 = vector.load %arg1[%c0, %c0_0, %c0_1] : memref<8x32x256xf32, #tpu.memory_space<vmem>>, vector<8x32x256xf32>
    %cst = arith.constant dense<0.000000e+00> : vector<8x32xf32>
    %1 = vector.multi_reduction <add>, %0, %cst [2] : vector<8x32x256xf32> to vector<8x32xf32>
    %cst_2 = arith.constant 2.560000e+02 : f32
    %2 = vector.broadcast %cst_2 : f32 to vector<8x32xf32>
    %3 = arith.divf %1, %2 : vector<8x32xf32>
    %cst_3 = arith.constant dense<0xFF800000> : vector<8x32xf32>
    %4 = vector.multi_reduction <maximumf>, %0, %cst_3 [2] : vector<8x32x256xf32> to vector<8x32xf32>
    %5 = tpu.concatenate %3, %4 in 0 : vector<8x32xf32>, vector<8x32xf32> -> vector<16x32xf32>
    %c0_4 = arith.constant 0 : index
    %c0_5 = arith.constant 0 : index
    %6 = vector.load %arg2[%c0_4, %c0_5] : memref<32x2xf32, #tpu.memory_space<vmem>>, vector<32x2xf32>
    %c0_6 = arith.constant 0 : index
    %c0_7 = arith.constant 0 : index
    %7 = vector.load %arg3[%c0_6, %c0_7] : memref<2x32xf32, #tpu.memory_space<vmem>>, vector<2x32xf32>
    %cst_8 = arith.constant dense<0.000000e+00> : vector<16x2xf32>
    %8 = tpu.matmul %5, %6, %cst_8 {dimension_numbers = #tpu.dot_dimension_numbers<[1], [0], [0], [1], [0, 0, 1, 1], [], []>} : vector<16x32xf32>, vector<32x2xf32>, vector<16x2xf32> -> vector<16x2xf32>
    %cst_9 = arith.constant 0.000000e+00 : f32
    %9 = vector.broadcast %cst_9 : f32 to vector<16x2xf32>
    %10 = arith.maximumf %8, %9 : vector<16x2xf32>
    %cst_10 = arith.constant dense<0.000000e+00> : vector<16x32xf32>
    %11 = tpu.matmul %10, %7, %cst_10 {dimension_numbers = #tpu.dot_dimension_numbers<[1], [0], [0], [1], [0, 0, 1, 1], [], []>} : vector<16x2xf32>, vector<2x32xf32>, vector<16x32xf32> -> vector<16x32xf32>
    %12 = vector.extract_strided_slice %11 {offsets = [0, 0], sizes = [8, 32], strides = [1, 1]} : vector<16x32xf32> to vector<8x32xf32>
    %13 = vector.extract_strided_slice %11 {offsets = [8, 0], sizes = [8, 32], strides = [1, 1]} : vector<16x32xf32> to vector<8x32xf32>
    %14 = arith.addf %12, %13 : vector<8x32xf32>
    %cst_11 = arith.constant 0.000000e+00 : f32
    %15 = vector.broadcast %cst_11 : f32 to vector<8x32xf32>
    %16 = arith.subf %15, %14 : vector<8x32xf32>
    %17 = math.exp %16 : vector<8x32xf32>
    %cst_12 = arith.constant 1.000000e+00 : f32
    %18 = vector.broadcast %cst_12 : f32 to vector<8x32xf32>
    %19 = arith.addf %18, %17 : vector<8x32xf32>
    %20 = tpu.reciprocal %19 {approx = true} : vector<8x32xf32> -> vector<8x32xf32>
    %21 = vector.shape_cast %20 : vector<8x32xf32> to vector<8x32x1xf32>
    %22 = vector.broadcast %21 : vector<8x32x1xf32> to vector<8x32x256xf32>
    %23 = arith.mulf %0, %22 : vector<8x32x256xf32>
    %cst_13 = arith.constant dense<0.000000e+00> : vector<8x256xf32>
    %24 = vector.multi_reduction <add>, %23, %cst_13 [1] : vector<8x32x256xf32> to vector<8x256xf32>
    %cst_14 = arith.constant 3.200000e+01 : f32
    %25 = vector.broadcast %cst_14 : f32 to vector<8x256xf32>
    %26 = arith.divf %24, %25 : vector<8x256xf32>
    %cst_15 = arith.constant dense<0xFF800000> : vector<8x256xf32>
    %27 = vector.multi_reduction <maximumf>, %23, %cst_15 [1] : vector<8x32x256xf32> to vector<8x256xf32>
    %28 = tpu.concatenate %26, %27 in 1 : vector<8x256xf32>, vector<8x256xf32> -> vector<8x512xf32>
    %29 = arith.truncf %28 : vector<8x512xf32> to vector<8x512xbf16>
    %c0_16 = arith.constant 0 : index
    %c0_17 = arith.constant 0 : index
    %30 = vector.load %arg4[%c0_16, %c0_17] : memref<512x256xbf16, #tpu.memory_space<vmem>>, vector<512x256xbf16>
    %cst_18 = arith.constant dense<0.000000e+00> : vector<8x256xf32>
    %31 = tpu.matmul %29, %30, %cst_18 {dimension_numbers = #tpu.dot_dimension_numbers<[1], [0], [0], [1], [0, 0, 1, 1], [], []>} : vector<8x512xbf16>, vector<512x256xbf16>, vector<8x256xf32> -> vector<8x256xf32>
    %cst_19 = arith.constant 0.000000e+00 : f32
    %32 = vector.broadcast %cst_19 : f32 to vector<8x256xf32>
    %33 = arith.subf %32, %31 : vector<8x256xf32>
    %34 = math.exp %33 : vector<8x256xf32>
    %cst_20 = arith.constant 1.000000e+00 : f32
    %35 = vector.broadcast %cst_20 : f32 to vector<8x256xf32>
    %36 = arith.addf %35, %34 : vector<8x256xf32>
    %37 = tpu.reciprocal %36 {approx = true} : vector<8x256xf32> -> vector<8x256xf32>
    %38 = vector.shape_cast %37 : vector<8x256xf32> to vector<8x1x256xf32>
    %39 = vector.broadcast %38 : vector<8x1x256xf32> to vector<8x32x256xf32>
    %40 = arith.mulf %23, %39 : vector<8x32x256xf32>
    %c0_21 = arith.constant 0 : index
    %c0_22 = arith.constant 0 : index
    %c0_23 = arith.constant 0 : index
    %41 = vector.load %arg5[%c0_21, %c0_22, %c0_23] : memref<8x32x256xf32, #tpu.memory_space<vmem>>, vector<8x32x256xf32>
    tpu.vector_store %arg5[%c0_21, %c0_22, %c0_23], %40 {strides = array<i32>} : memref<8x32x256xf32, #tpu.memory_space<vmem>>, vector<8x32x256xf32>,
    return
  }
  func.func @transform_0(%arg0: i32) -> (i32, i32, i32) {
    %c0_i32 = arith.constant 0 : i32
    %c0_i32_0 = arith.constant 0 : i32
    %c0_i32_1 = arith.constant 0 : i32
    return %arg0, %c0_i32, %c0_i32_0 : i32, i32, i32
  }
  func.func @transform_1(%arg0: i32) -> (i32, i32) {
    %c0_i32 = arith.constant 0 : i32
    %c0_i32_0 = arith.constant 0 : i32
    %c0_i32_1 = arith.constant 0 : i32
    return %c0_i32, %c0_i32_0 : i32, i32
  }
  func.func @transform_2(%arg0: i32) -> (i32, i32) {
    %c0_i32 = arith.constant 0 : i32
    %c0_i32_0 = arith.constant 0 : i32
    %c0_i32_1 = arith.constant 0 : i32
    return %c0_i32, %c0_i32_0 : i32, i32
  }
  func.func @transform_3(%arg0: i32) -> (i32, i32) {
    %c0_i32 = arith.constant 0 : i32
    %c0_i32_0 = arith.constant 0 : i32
    %c0_i32_1 = arith.constant 0 : i32
    return %c0_i32, %c0_i32_0 : i32, i32
  }
  func.func @transform_4(%arg0: i32) -> (i32, i32, i32) {
    %c0_i32 = arith.constant 0 : i32
    %c0_i32_0 = arith.constant 0 : i32
    %c0_i32_1 = arith.constant 0 : i32
    return %arg0, %c0_i32, %c0_i32_0 : i32, i32, i32
  }
}

</mosaic_0001>

<bundles_post_ra>
// kernel: tpu_custom_call.1
= control target key start
LH: loop header
LB: loop body
LE: loop exit
PB: predicated region body
PF: predicated region fallthrough
CT: control target
= control target key end

     0   :  { %9 = vsyncpa [#allocation3], 0  ;;  %s3653_s0 = inlined_call_operand.hbm [shape: f32[8,32,256], index: 0, kind: input, shape index: {}]   ;;  %s3654_s1 = inlined_call_operand.vmem [shape: f32[32,2], index: 1, kind: input, shape index: {}]   ;;  %s3655_s2 = inlined_call_operand.vmem [shape: f32[2,32], index: 2, kind: input, shape index: {}]   ;;  %s3656_s3 = inlined_call_operand.hbm [shape: bf16[512,256], index: 3, kind: input, shape index: {}]   ;;  %s3657_s4 = inlined_call_operand.hbm [shape: f32[8,32,256], index: 4, kind: output, shape index: {}]  }
   0x1   :  { %10 = vsyncpa [#allocation6], 0 }
   0x2   :  { %11 = vsyncpa [#allocation4], 0  ;;  %s2610_s15 = smov [#allocation2]   ;;  %s2538_s19 = scalar_lea.hbm %s3653_s0, 8192 }
   0x3   :  { %s17_s16 = sshll.u32 %s2610_s15, 4  ;;  %p2539_p0 = scmp.ne.s32.totalorder %s3653_s0, %s2538_s19  ;;  %s18_s16 = int_to_ptr.vmem [resolvable:$true] %s17_s16 }
   0x4   :  { %p2542_p1 = scmp.lt.u32.totalorder %s2538_s19, %s3653_s0 }
   0x6   :  { %p2544_p2 = pnand %p2542_p1, %p2539_p0 }
   0x8   :  { %2547 = shalt.err (!%p2544_p2)
}
   0x9   :  { %s2548_s24 = scalar_lea.vmem %s18_s16, 8192  ;;  %p2553_p4 = scmp.lt.s32.totalorder %s18_s16, %s18_s16 }
   0xa   :  { %p2549_p3 = scmp.ne.s32.totalorder %s18_s16, %s2548_s24  ;;  %p2554_p5 = scmp.lt.s32.totalorder %s2548_s24, %s2548_s24 }
   0xc   :  { %p2555_p6 = por %p2554_p5, %p2553_p4 }
   0xe   :  { %p2556_p7 = pnand %p2555_p6, %p2549_p3 }
  0x10   :  { %2559 = shalt.err (!%p2556_p7)
}
  0x11   :  { %s2611_s25 = smov 256   ;;  %s2612_s26 = smov 16  }
  0x12   :  { %23 = dma.hbm_to_vmem [thread:$0]  %s3653_s0, 8192, %s18_s16, [#allocation3], %s2611_s25, %s2611_s25, %s2612_s26  }
  0x13   :  { %s2613_s29 = smov [#allocation5]   ;;  %s2560_s7 = scalar_lea.hbm %s3656_s3, 8192 }
  0x14   :  { %s33_s30 = sshll.u32 %s2613_s29, 4  ;;  %p2561_p8 = scmp.ne.s32.totalorder %s3656_s3, %s2560_s7  ;;  %s34_s30 = int_to_ptr.vmem [resolvable:$true] %s33_s30 }
  0x15   :  { %p2564_p9 = scmp.lt.u32.totalorder %s2560_s7, %s3656_s3 }
  0x17   :  { %p2566_p10 = pnand %p2564_p9, %p2561_p8 }
  0x19   :  { %2569 = shalt.err (!%p2566_p10)
}
  0x1a   :  { %s2570_s12 = scalar_lea.vmem %s34_s30, 8192  ;;  %p2575_p12 = scmp.lt.s32.totalorder %s34_s30, %s34_s30 }
  0x1b   :  { %p2571_p11 = scmp.ne.s32.totalorder %s34_s30, %s2570_s12  ;;  %p2576_p13 = scmp.lt.s32.totalorder %s2570_s12, %s2570_s12 }
  0x1d   :  { %p2577_p0 = por %p2576_p13, %p2575_p12 }
  0x1f   :  { %p2578_p1 = pnand %p2577_p0, %p2571_p11 }
  0x21   :  { %2581 = shalt.err (!%p2578_p1)
}
  0x22   :  { %s2614_s0 = smov 128   ;;  %s2615_s13 = smov 8  }
  0x23   :  { %39 = dma.hbm_to_vmem [thread:$0]  %s3656_s3, 8192, %s34_s30, [#allocation6], %s2614_s0, %s2614_s0, %s2615_s13  }
  0x24   :  { %2604 = dma.done.wait [#allocation3], 8192  }
  0x25   :  { %2605 = vsyncadd [#allocation3], 4294959104 }
  0x26   :  { %2606 = dma.done.wait [#allocation6], 8192  }
  0x27   :  { %2607 = vsyncadd [#allocation6], 4294959104  ;;  %v2670_v0 = vld [vmem:[#allocation2 + $0x40] sm:$0xff]  ;;  %v2672_v1 = vld [vmem:[#allocation2 + $0x48] sm:$0xff]  ;;  %vm378_vm0 = vcmask 130112   ;;  %vm385_vm1 = vcmask 195712  }
  0x28   :  { %v2674_v2 = vld [vmem:[#allocation2] sm:$0xff]  ;;  %v122_v3 = vadd.f32 %v2672_v1, %v2670_v0  ;;  %v2678_v4 = vld [vmem:[#allocation2 + $0x8] sm:$0xff]  ;;  %v2680_v5 = vld [vmem:[#allocation2 + $0x50] sm:$0xff]  ;;  %v251_v54 = vmax.f32 %v2670_v0, %v2672_v1  ;;  %vm392_vm2 = vcmask 261312   ;;  %vm527_vm3 = vcmask 1041409  }
  0x29   :  { %v2682_v6 = vld [vmem:[#allocation2 + $0x58] sm:$0xff]  ;;  %v110_v7 = vadd.f32 %v2678_v4, %v2674_v2  ;;  %v2686_v8 = vld [vmem:[#allocation2 + $0x10] sm:$0xff]  ;;  %v2694_v12 = vld [vmem:[#allocation2 + $0x60] sm:$0xff]  ;;  %v239_v50 = vmax.f32 %v2674_v2, %v2678_v4  ;;  %vm529_vm4 = vcmask 1042434   ;;  %vm531_vm5 = vcmask 1043459  }
  0x2a   :  { %v2688_v9 = vld [vmem:[#allocation2 + $0x18] sm:$0xff]  ;;  %123 = vadd.xlane.f32.xlu1 %v122_v3  ;;  %v125_v10 = vadd.f32 %v2682_v6, %v2680_v5  ;;  %v2696_v13 = vld [vmem:[#allocation2 + $0x68] sm:$0xff]  ;;  %v2698_v14 = vld [vmem:[#allocation2 + $0x20] sm:$0xff]  ;;  %v254_v61 = vmax.f32 %v2680_v5, %v2682_v6  ;;  %vm533_vm6 = vcmask 1044484   ;;  %vm535_vm7 = vcmask 1045509  }
  0x2b   :  { %111 = vadd.xlane.f32.xlu0 %v110_v7  ;;  %v113_v11 = vadd.f32 %v2688_v9, %v2686_v8  ;;  %v2700_v15 = vld [vmem:[#allocation2 + $0x28] sm:$0xff]  ;;  %v128_v16 = vadd.f32 %v2696_v13, %v2694_v12  ;;  %v2706_v18 = vld [vmem:[#allocation2 + $0x90] sm:$0xff]  ;;  %v2708_v19 = vld [vmem:[#allocation2 + $0x98] sm:$0xff]  ;;  %v242_v55 = vmax.f32 %v2686_v8, %v2688_v9  ;;  %v257_v5 = vmax.f32 %v2694_v12, %v2696_v13 }
  0x2c   :  { %v116_v17 = vadd.f32 %v2700_v15, %v2698_v14  ;;  %v2710_v20 = vld [vmem:[#allocation2 + $0x80] sm:$0xff]  ;;  %v2712_v21 = vld [vmem:[#allocation2 + $0x88] sm:$0xff]  ;;  %v137_v22 = vadd.f32 %v2708_v19, %v2706_v18  ;;  %v2718_v24 = vld [vmem:[#allocation2 + $0x70] sm:$0xff]  ;;  %v245_v2 = vmax.f32 %v2698_v14, %v2700_v15  ;;  %v266_v9 = vmax.f32 %v2706_v18, %v2708_v19 }
  0x2d   :  { %v134_v23 = vadd.f32 %v2712_v21, %v2710_v20  ;;  %v2720_v25 = vld [vmem:[#allocation2 + $0x78] sm:$0xff]  ;;  %v2722_v26 = vld [vmem:[#allocation2 + $0x30] sm:$0xff]  ;;  %v2730_v30 = vld [vmem:[#allocation2 + $0xc0] sm:$0xff]  ;;  %v263_v4 = vmax.f32 %v2710_v20, %v2712_v21  ;;  %vm537_vm8 = vcmask 1046534   ;;  %vm539_vm9 = vcmask 1047559  }
  0x2e   :  { %126 = vadd.xlane.f32.xlu1 %v125_v10  ;;  %v2724_v27 = vld [vmem:[#allocation2 + $0x38] sm:$0xff]  ;;  %v131_v28 = vadd.f32 %v2720_v25, %v2718_v24  ;;  %v2732_v31 = vld [vmem:[#allocation2 + $0xc8] sm:$0xff]  ;;  %v2734_v32 = vld [vmem:[#allocation2 + $0xa0] sm:$0xff]  ;;  %v260_v21 = vmax.f32 %v2718_v24, %v2720_v25  ;;  %vm737_vm10 = vcmask 261120   ;;  %vm826_vm11 = vcmask 1041408  }
  0x2f   :  { %114 = vadd.xlane.f32.xlu0 %v113_v11  ;;  %v119_v29 = vadd.f32 %v2724_v27, %v2722_v26  ;;  %v2736_v33 = vld [vmem:[#allocation2 + $0xa8] sm:$0xff]  ;;  %v146_v34 = vadd.f32 %v2732_v31, %v2730_v30  ;;  %v2742_v36 = vld [vmem:[#allocation2 + $0xb0] sm:$0xff]  ;;  %v2744_v37 = vld [vmem:[#allocation2 + $0xb8] sm:$0xff]  ;;  %v248_v18 = vmax.f32 %v2722_v26, %v2724_v27  ;;  %vm819_vm12 = vcmask 15360  }
  0x30   :  { %v140_v35 = vadd.f32 %v2736_v33, %v2734_v32  ;;  %v2746_v38 = vld [vmem:[#allocation2 + $0xd0] sm:$0xff]  ;;  %v2748_v39 = vld [vmem:[#allocation2 + $0xd8] sm:$0xff]  ;;  %v2750_v40 = vld [vmem:[#allocation2 + $0x100] sm:$0xff]  ;;  %v143_v42 = vadd.f32 %v2744_v37, %v2742_v36  ;;  %v269_v20 = vmax.f32 %v2734_v32, %v2736_v33 }
  0x31   :  { %v2752_v41 = vld [vmem:[#allocation2 + $0x108] sm:$0xff]  ;;  %v2756_v43 = vld [vmem:[#allocation2 + $0xe0] sm:$0xff]  ;;  %v149_v45 = vadd.f32 %v2748_v39, %v2746_v38  ;;  %v2764_v47 = vld [vmem:[#allocation2 + $0x110] sm:$0xff] }
  0x32   :  { %129 = vadd.xlane.f32.xlu1 %v128_v16  ;;  %v2758_v44 = vld [vmem:[#allocation2 + $0xe8] sm:$0xff]  ;;  %v158_v46 = vadd.f32 %v2752_v41, %v2750_v40  ;;  %v2766_v48 = vld [vmem:[#allocation2 + $0x118] sm:$0xff]  ;;  %v2774_v52 = vld [vmem:[#allocation2 + $0xf0] sm:$0xff] }
  0x33   :  { %117 = vadd.xlane.f32.xlu0 %v116_v17  ;;  %v152_v49 = vadd.f32 %v2758_v44, %v2756_v43  ;;  %v161_v51 = vadd.f32 %v2766_v48, %v2764_v47  ;;  %v2776_v53 = vld [vmem:[#allocation2 + $0xf8] sm:$0xff]  ;;  %v2782_v56 = vld [vmem:[#allocation2 + $0x140] sm:$0xff]  ;;  %v2784_v57 = vld [vmem:[#allocation2 + $0x148] sm:$0xff] }
  0x34   :  { %v155_v58 = vadd.f32 %v2776_v53, %v2774_v52  ;;  %v2788_v59 = vld [vmem:[#allocation2 + $0x120] sm:$0xff]  ;;  %v2790_v60 = vld [vmem:[#allocation2 + $0x128] sm:$0xff]  ;;  %v170_v62 = vadd.f32 %v2784_v57, %v2782_v56  ;;  %v2798_v0 = vld [vmem:[#allocation2 + $0x150] sm:$0xff] }
  0x35   :  { %v164_v63 = vadd.f32 %v2790_v60, %v2788_v59  ;;  %v2800_v1 = vld [vmem:[#allocation2 + $0x158] sm:$0xff]  ;;  %v2810_v6 = vld [vmem:[#allocation2 + $0x130] sm:$0xff]  ;;  %v2818_v10 = vld [vmem:[#allocation2 + $0x180] sm:$0xff] }
  0x36   :  { %138 = vadd.xlane.f32.xlu1 %v137_v22  ;;  %v173_v3 = vadd.f32 %v2800_v1, %v2798_v0  ;;  %v2812_v7 = vld [vmem:[#allocation2 + $0x138] sm:$0xff]  ;;  %v2820_v11 = vld [vmem:[#allocation2 + $0x188] sm:$0xff]  ;;  %v2822_v14 = vld [vmem:[#allocation2 + $0x160] sm:$0xff]  ;;  %v278_v22 = vmax.f32 %v2746_v38, %v2748_v39  ;;  %v290_v39 = vmax.f32 %v2764_v47, %v2766_v48 }
  0x37   :  { %135 = vadd.xlane.f32.xlu0 %v134_v23  ;;  %v167_v8 = vadd.f32 %v2812_v7, %v2810_v6  ;;  %v2824_v15 = vld [vmem:[#allocation2 + $0x168] sm:$0xff]  ;;  %v182_v12 = vadd.f32 %v2820_v11, %v2818_v10  ;;  %v2830_v16 = vld [vmem:[#allocation2 + $0x190] sm:$0xff]  ;;  %v2832_v17 = vld [vmem:[#allocation2 + $0x198] sm:$0xff]  ;;  %v275_v23 = vmax.f32 %v2730_v30, %v2732_v31  ;;  %v281_v30 = vmax.f32 %v2756_v43, %v2758_v44 }
  0x38   :  { %v176_v13 = vadd.f32 %v2824_v15, %v2822_v14  ;;  %v185_v19 = vadd.f32 %v2832_v17, %v2830_v16  ;;  %v98_v26 = vld [vmem:[#allocation2 + $0x1a0] sm:$0xff]  ;;  %v99_v27 = vld [vmem:[#allocation2 + $0x1a8] sm:$0xff]  ;;  %v104_v33 = vld [vmem:[#allocation2 + $0x1d0] sm:$0xff]  ;;  %v272_v31 = vmax.f32 %v2742_v36, %v2744_v37  ;;  %v293_v36 = vmax.f32 %v2788_v59, %v2790_v60 }
  0x39   :  { %v103_v24 = vld [vmem:[#allocation2 + $0x1c8] sm:$0xff]  ;;  %v284_v37 = vmax.f32 %v2774_v52, %v2776_v53  ;;  %v108_v44 = vld [vmem:[#allocation2 + $0x1f0] sm:$0xff]  ;;  %v109_v47 = vld [vmem:[#allocation2 + $0x1f8] sm:$0xff]  ;;  %v296_v48 = vmax.f32 %v2810_v6, %v2812_v7  ;;  %v311_v52 = vmax.f32 %v2818_v10, %v2820_v11  ;;  %v305_v53 = vmax.f32 %v2822_v14, %v2824_v15 }
  0x3a   :  { %132 = vadd.xlane.f32.xlu1 %v131_v28  ;;  %v92_v28 = vld [vmem:[#allocation2 + $0x170] sm:$0xff]  ;;  %v317_v59 = vmax.f32 %v98_v26, %v99_v27 }
  0x3b   :  { %120 = vadd.xlane.f32.xlu0 %v119_v29  ;;  %v93_v29 = vld [vmem:[#allocation2 + $0x178] sm:$0xff] }
  0x3c   :  { %v179_v32 = vadd.f32 %v93_v29, %v92_v28 }
  0x3e   :  { %147 = vadd.xlane.f32.xlu1 %v146_v34  ;;  %v188_v34 = vadd.f32 %v99_v27, %v98_v26 }
  0x3f   :  { %141 = vadd.xlane.f32.xlu0 %v140_v35  ;;  %v105_v35 = vld [vmem:[#allocation2 + $0x1d8] sm:$0xff] }
  0x40   :  { %v197_v25 = vadd.f32 %v105_v35, %v104_v33 }
  0x42   :  { %144 = vadd.xlane.f32.xlu1 %v143_v42  ;;  %v102_v42 = vld [vmem:[#allocation2 + $0x1c0] sm:$0xff] }
  0x43   :  { %150 = vadd.xlane.f32.xlu0 %v149_v45  ;;  %v194_v38 = vadd.f32 %v103_v24, %v102_v42  ;;  %v287_v45 = vmax.f32 %v2750_v40, %v2752_v41  ;;  %v302_v40 = vmax.f32 %v2798_v0, %v2800_v1  ;;  %v299_v41 = vmax.f32 %v2782_v56, %v2784_v57  ;;  %v732_v0 = vld [vmem:[%s3654_s1] sm:$0xff]  ;;  %v733_v1 = vld [vmem:[%s3654_s1 + $0x8] sm:$0xff] }
  0x44   :  { %v314_v56 = vmax.f32 %v2830_v16, %v2832_v17  ;;  %v323_v57 = vmax.f32 %v102_v42, %v103_v24 }
  0x46   :  { %159 = vadd.xlane.f32.xlu1 %v158_v46  ;;  %v106_v46 = vld [vmem:[#allocation2 + $0x1e0] sm:$0xff] }
  0x47   :  { %153 = vadd.xlane.f32.xlu0 %v152_v49  ;;  %v107_v49 = vld [vmem:[#allocation2 + $0x1e8] sm:$0xff] }
  0x4a   :  { %240 = vmax.xlane.f32.xlu1 %v239_v50  ;;  %v100_v50 = vld [vmem:[#allocation2 + $0x1b0] sm:$0xff] }
  0x4b   :  { %162 = vadd.xlane.f32.xlu0 %v161_v51  ;;  %v101_v51 = vld [vmem:[#allocation2 + $0x1b8] sm:$0xff] }
  0x4c   :  { %v191_v43 = vadd.f32 %v101_v51, %v100_v50  ;;  %v320_v60 = vmax.f32 %v100_v50, %v101_v51 }
  0x4e   :  { %252 = vmax.xlane.f32.xlu1 %v251_v54  ;;  %v200_v54 = vadd.f32 %v107_v49, %v106_v46 }
  0x4f   :  { %243 = vmax.xlane.f32.xlu0 %v242_v55  ;;  %v203_v55 = vadd.f32 %v109_v47, %v108_v44 }
  0x52   :  { %156 = vadd.xlane.f32.xlu1 %v155_v58  ;;  %v308_v58 = vmax.f32 %v92_v28, %v93_v29 }
  0x53   :  { %255 = vmax.xlane.f32.xlu0 %v254_v61  ;;  %v326_v61 = vmax.f32 %v104_v33, %v105_v35 }
  0x56   :  { %171 = vadd.xlane.f32.xlu1 %v170_v62  ;;  %v332_v62 = vmax.f32 %v108_v44, %v109_v47 }
  0x57   :  { %165 = vadd.xlane.f32.xlu0 %v164_v63  ;;  %v329_v63 = vmax.f32 %v106_v46, %v107_v49 }
  0x5a   :  { %246 = vmax.xlane.f32.xlu1 %v245_v2  ;;  %v367_v2 = vlaneseq }
  0x5b   :  { %174 = vadd.xlane.f32.xlu0 %v173_v3  ;;  %v2348_v3 = vpack.c.bf16 %v733_v1, %v732_v0 }
  0x5c   :  { %v368_v6 = vand.u32 127, %v367_v2 }
  0x5d   :  { %2349 = vmatprep.subr.bf16.mxu0 %v2348_v3 }
  0x5e   :  { %264 = vmax.xlane.f32.xlu1 %v263_v4  ;;  %2351 = vmatpush3.bf16.msra.mxu0 %v2348_v3  ;;  %v734_v4 = vld [vmem:[%s3654_s1 + $0x10] sm:$0xff]  ;;  %v387_v24 = vadd.s32 4294967272, %v368_v6 }
  0x5f   :  { %258 = vmax.xlane.f32.xlu0 %v257_v5  ;;  %v735_v5 = vld [vmem:[%s3654_s1 + $0x18] sm:$0xff] }
  0x60   :  { %v2352_v7 = vpack.c.bf16 %v735_v5, %v734_v4 }
  0x62   :  { %168 = vadd.xlane.f32.xlu1 %v167_v8  ;;  %v2882_v8 = vshrl.u32 %v367_v2, 7  ;;  %2353 = vmatprep.subr.bf16.mxu0 %v2352_v7 }
  0x63   :  { %267 = vmax.xlane.f32.xlu0 %v266_v9  ;;  %v373_v9 = vadd.s32 4294967288, %v368_v6  ;;  %2355 = vmatpush3.bf16.msra.mxu0 %v2352_v7 }
  0x64   :  { %v2885_v14 = vsub.s32 %v368_v6, %v2882_v8  ;;  %v2905_v50 = vsub.s32 %v387_v24, %v2882_v8 }
  0x66   :  { %183 = vadd.xlane.f32.xlu1 %v182_v12  ;;  %v2888_v12 = vsub.s32 %v373_v9, %v2882_v8 }
  0x67   :  { %177 = vadd.xlane.f32.xlu0 %v176_v13  ;;  %v380_v13 = vadd.s32 4294967280, %v368_v6 }
  0x6a   :  { %249 = vmax.xlane.f32.xlu1 %v248_v18 }
  0x6b   :  { %186 = vadd.xlane.f32.xlu0 %v185_v19 }
  0x6e   :  { %270 = vmax.xlane.f32.xlu1 %v269_v20 }
  0x6f   :  { %261 = vmax.xlane.f32.xlu0 %v260_v21 }
  0x72   :  { %279 = vmax.xlane.f32.xlu1 %v278_v22 }
  0x73   :  { %276 = vmax.xlane.f32.xlu0 %v275_v23  ;;  %v2893_v23 = vsub.s32 %v380_v13, %v2882_v8 }
  0x76   :  { %189 = vadd.xlane.f32.xlu1 %v188_v34 }
  0x77   :  { %180 = vadd.xlane.f32.xlu0 %v179_v32 }
  0x7a   :  { %198 = vadd.xlane.f32.xlu1 %v197_v25 }
  0x7b   :  { %195 = vadd.xlane.f32.xlu0 %v194_v38 }
  0x7e   :  { %282 = vmax.xlane.f32.xlu1 %v281_v30 }
  0x7f   :  { %273 = vmax.xlane.f32.xlu0 %v272_v31 }
  0x82   :  { %291 = vmax.xlane.f32.xlu1 %v290_v39 }
  0x83   :  { %288 = vmax.xlane.f32.xlu0 %v287_v45 }
  0x86   :  { %201 = vadd.xlane.f32.xlu1 %v200_v54 }
  0x87   :  { %192 = vadd.xlane.f32.xlu0 %v191_v43 }
  0x8a   :  { %294 = vmax.xlane.f32.xlu1 %v293_v36 }
  0x8b   :  { %285 = vmax.xlane.f32.xlu0 %v284_v37 }
  0x8e   :  { %303 = vmax.xlane.f32.xlu1 %v302_v40 }
  0x8f   :  { %300 = vmax.xlane.f32.xlu0 %v299_v41 }
  0x92   :  { %297 = vmax.xlane.f32.xlu1 %v296_v48 }
  0x93   :  { %204 = vadd.xlane.f32.xlu0 %v203_v55 }
  0x96   :  { %312 = vmax.xlane.f32.xlu1 %v311_v52 }
  0x97   :  { %306 = vmax.xlane.f32.xlu0 %v305_v53 }
  0x9a   :  { %309 = vmax.xlane.f32.xlu1 %v308_v58 }
  0x9b   :  { %315 = vmax.xlane.f32.xlu0 %v314_v56 }
  0x9e   :  { %324 = vmax.xlane.f32.xlu1 %v323_v57 }
  0x9f   :  { %318 = vmax.xlane.f32.xlu0 %v317_v59 }
  0xa2   :  { %321 = vmax.xlane.f32.xlu1 %v320_v60 }
  0xa3   :  { %327 = vmax.xlane.f32.xlu0 %v326_v61 }
  0xa6   :  { %333 = vmax.xlane.f32.xlu1 %v332_v62 }
  0xa7   :  { %330 = vmax.xlane.f32.xlu0 %v329_v63 }
  0xb7   :  { %v124_v10 = vpop.xlane.xlu1 %123 }
  0xb8   :  { %v112_v11 = vpop.xlane.xlu0 %111  ;;  %v211_v15 = vmul.f32 0.00390625, %v124_v10 }
  0xb9   :  { %v207_v16 = vmul.f32 0.00390625, %v112_v11 }
  0xba   :  { %v397_v21 = vrot.slane %v211_v15, %v2885_v14 }
  0xbb   :  { %v127_v17 = vpop.xlane.xlu1 %126  ;;  %v372_v26 = vrot.slane %v207_v16, %v2885_v14 }
  0xbc   :  { %v212_v18 = vmul.f32 0.00390625, %v127_v17  ;;  %v115_v19 = vpop.xlane.xlu0 %114 }
  0xbd   :  { %v208_v20 = vmul.f32 0.00390625, %v115_v19 }
  0xbe   :  { %v401_v22 = vrot.slane %v212_v18, %v2888_v12 }
  0xbf   :  { %v377_v27 = vrot.slane %v208_v20, %v2888_v12  ;;  %v130_v28 = vpop.xlane.xlu1 %129 }
  0xc0   :  { %v402_v29 = vsel %vm378_vm0, %v401_v22, %v397_v21  ;;  %v213_v34 = vmul.f32 0.00390625, %v130_v28  ;;  %v118_v32 = vpop.xlane.xlu0 %117 }
  0xc1   :  { %v379_v33 = vsel %vm378_vm0, %v377_v27, %v372_v26  ;;  %v209_v35 = vmul.f32 0.00390625, %v118_v32 }
  0xc2   :  { %v406_v42 = vrot.slane %v213_v34, %v2893_v23 }
  0xc3   :  { %v384_v25 = vrot.slane %v209_v35, %v2893_v23  ;;  %v139_v38 = vpop.xlane.xlu1 %138 }
  0xc4   :  { %v407_v30 = vsel %vm385_vm1, %v406_v42, %v402_v29  ;;  %v216_v31 = vmul.f32 0.00390625, %v139_v38  ;;  %v136_v39 = vpop.xlane.xlu0 %135 }
  0xc5   :  { %v386_v45 = vsel %vm385_vm1, %v384_v25, %v379_v33  ;;  %v215_v46 = vmul.f32 0.00390625, %v136_v39 }
  0xc6   :  { %v420_v49 = vrot.slane %v216_v31, %v2888_v12 }
  0xc7   :  { %v416_v51 = vrot.slane %v215_v46, %v2885_v14  ;;  %v133_v54 = vpop.xlane.xlu1 %132 }
  0xc8   :  { %v214_v43 = vmul.f32 0.00390625, %v133_v54  ;;  %v121_v36 = vpop.xlane.xlu0 %120 }
  0xc9   :  { %v421_v37 = vsel %vm378_vm0, %v420_v49, %v416_v51  ;;  %v210_v40 = vmul.f32 0.00390625, %v121_v36 }
  0xca   :  { %v411_v41 = vrot.slane %v214_v43, %v2905_v50 }
  0xcb   :  { %v391_v44 = vrot.slane %v210_v40, %v2905_v50  ;;  %v148_v47 = vpop.xlane.xlu1 %147 }
  0xcc   :  { %v412_v48 = vsel %vm392_vm2, %v411_v41, %v407_v30  ;;  %v142_v55 = vpop.xlane.xlu0 %141  ;;  %v219_v56 = vmul.f32 0.00390625, %v148_v47 }
  0xcd   :  { %v393_v52 = vsel %vm392_vm2, %v391_v44, %v386_v45  ;;  %v217_v53 = vmul.f32 0.00390625, %v142_v55 }
  0xce   :  { %v528_v58 = vsel %vm527_vm3, %v412_v48, %v393_v52  ;;  %v435_v1 = vrot.slane %v219_v56, %v2885_v14 }
  0xcf   :  { %v425_v57 = vrot.slane %v217_v53, %v2893_v23  ;;  %v145_v59 = vpop.xlane.xlu1 %144 }
  0xd0   :  { %v218_v60 = vmul.f32 0.00390625, %v145_v59  ;;  %v151_v61 = vpop.xlane.xlu0 %150 }
  0xd1   :  { %v426_v62 = vsel %vm385_vm1, %v425_v57, %v421_v37  ;;  %v220_v63 = vmul.f32 0.00390625, %v151_v61 }
  0xd2   :  { %v430_v0 = vrot.slane %v218_v60, %v2905_v50 }
  0xd3   :  { %v439_v2 = vrot.slane %v220_v63, %v2888_v12  ;;  %v160_v3 = vpop.xlane.xlu1 %159 }
  0xd4   :  { %v431_v4 = vsel %vm392_vm2, %v430_v0, %v426_v62  ;;  %v154_v5 = vpop.xlane.xlu0 %153  ;;  %v223_v10 = vmul.f32 0.00390625, %v160_v3 }
  0xd5   :  { %v530_v6 = vsel %vm529_vm4, %v431_v4, %v528_v58  ;;  %v440_v7 = vsel %vm378_vm0, %v439_v2, %v435_v1  ;;  %v221_v9 = vmul.f32 0.00390625, %v154_v5 }
  0xd6   :  { %v454_v18 = vrot.slane %v223_v10, %v2885_v14 }
  0xd7   :  { %v444_v11 = vrot.slane %v221_v9, %v2893_v23  ;;  %v241_v15 = vpop.xlane.xlu1 %240 }
  0xd8   :  { %v163_v13 = vpop.xlane.xlu0 %162  ;;  %v576_v22 = vrot.slane %v241_v15, %v2885_v14 }
  0xd9   :  { %v445_v16 = vsel %vm385_vm1, %v444_v11, %v440_v7  ;;  %v224_v17 = vmul.f32 0.00390625, %v163_v13 }
  0xdb   :  { %v458_v19 = vrot.slane %v224_v17, %v2888_v12  ;;  %v253_v20 = vpop.xlane.xlu1 %252 }
  0xdc   :  { %v244_v21 = vpop.xlane.xlu0 %243  ;;  %v595_v33 = vrot.slane %v253_v20, %v2885_v14 }
  0xdd   :  { %v459_v26 = vsel %vm378_vm0, %v458_v19, %v454_v18  ;;  %v580_v27 = vrot.slane %v244_v21, %v2888_v12 }
  0xdf   :  { %v581_v28 = vsel %vm378_vm0, %v580_v27, %v576_v22  ;;  %v157_v29 = vpop.xlane.xlu1 %156 }
  0xe0   :  { %v222_v34 = vmul.f32 0.00390625, %v157_v29  ;;  %v256_v32 = vpop.xlane.xlu0 %255 }
  0xe1   :  { %v599_v35 = vrot.slane %v256_v32, %v2888_v12 }
  0xe2   :  { %v449_v42 = vrot.slane %v222_v34, %v2905_v50 }
  0xe3   :  { %v600_v24 = vsel %vm378_vm0, %v599_v35, %v595_v33  ;;  %v172_v25 = vpop.xlane.xlu1 %171 }
  0xe4   :  { %v450_v38 = vsel %vm392_vm2, %v449_v42, %v445_v16  ;;  %v166_v30 = vpop.xlane.xlu0 %165  ;;  %v227_v42 = vmul.f32 0.00390625, %v172_v25 }
  0xe5   :  { %v532_v31 = vsel %vm531_vm5, %v450_v38, %v530_v6  ;;  %v225_v51 = vmul.f32 0.00390625, %v166_v30 }
  0xe7   :  { %v247_v39 = vpop.xlane.xlu1 %246  ;;  %v463_v37 = vrot.slane %v225_v51, %v2893_v23 }
  0xe8   :  { %v585_v45 = vrot.slane %v247_v39, %v2893_v23  ;;  %v175_v46 = vpop.xlane.xlu0 %174 }
  0xe9   :  { %v464_v55 = vsel %vm385_vm1, %v463_v37, %v459_v26  ;;  %v228_v29 = vmul.f32 0.00390625, %v175_v46  ;;  %v473_v37 = vrot.slane %v227_v42, %v2885_v14 }
  0xea   :  { %v586_v49 = vsel %vm385_vm1, %v585_v45, %v581_v28 }
  0xeb   :  { %v265_v54 = vpop.xlane.xlu1 %264  ;;  %v477_v39 = vrot.slane %v228_v29, %v2888_v12 }
  0xec   :  { %v259_v43 = vpop.xlane.xlu0 %258  ;;  %v614_v15 = vrot.slane %v265_v54, %v2885_v14 }
  0xed   :  { %v604_v36 = vrot.slane %v259_v43, %v2893_v23 }
  0xef   :  { %v605_v40 = vsel %vm385_vm1, %v604_v36, %v600_v24  ;;  %v169_v41 = vpop.xlane.xlu1 %168 }
  0xf0   :  { %v226_v44 = vmul.f32 0.00390625, %v169_v41  ;;  %v268_v47 = vpop.xlane.xlu0 %267 }
  0xf1   :  { %v618_v10 = vrot.slane %v268_v47, %v2888_v12  ;;  %v478_v47 = vsel %vm378_vm0, %v477_v39, %v473_v37 }
  0xf2   :  { %v468_v48 = vrot.slane %v226_v44, %v2905_v50 }
  0xf3   :  { %v184_v52 = vpop.xlane.xlu1 %183  ;;  %v619_v17 = vsel %vm378_vm0, %v618_v10, %v614_v15 }
  0xf4   :  { %v469_v53 = vsel %vm392_vm2, %v468_v48, %v464_v55  ;;  %v178_v58 = vpop.xlane.xlu0 %177  ;;  %v231_v30 = vmul.f32 0.00390625, %v184_v52 }
  0xf5   :  { %v2945_v56 = vsel %vm533_vm6, %v469_v53, %v532_v31  ;;  %v229_v32 = vmul.f32 0.00390625, %v178_v58 }
  0xf6   :  { %v492_v41 = vrot.slane %v231_v30, %v2885_v14 }
  0xf7   :  { %v250_v57 = vpop.xlane.xlu1 %249  ;;  %v482_v54 = vrot.slane %v229_v32, %v2893_v23 }
  0xf8   :  { %v187_v59 = vpop.xlane.xlu0 %186  ;;  %v590_v60 = vrot.slane %v250_v57, %v2905_v50 }
  0xf9   :  { %v232_v33 = vmul.f32 0.00390625, %v187_v59  ;;  %v483_v53 = vsel %vm385_vm1, %v482_v54, %v478_v47 }
  0xfa   :  { %v591_v0 = vsel %vm392_vm2, %v590_v60, %v586_v49 }
  0xfb   :  { %v271_v61 = vpop.xlane.xlu1 %270  ;;  %v496_v46 = vrot.slane %v232_v33, %v2888_v12 }
  0xfc   :  { %v262_v62 = vpop.xlane.xlu0 %261  ;;  %v623_v11 = vrot.slane %v271_v61, %v2893_v23 }
  0xfd   :  { %v609_v63 = vrot.slane %v262_v62, %v2905_v50  ;;  %v497_v58 = vsel %vm378_vm0, %v496_v46, %v492_v41 }
  0xfe   :  { %v624_v19 = vsel %vm385_vm1, %v623_v11, %v619_v17 }
  0xff   :  { %v610_v1 = vsel %vm392_vm2, %v609_v63, %v605_v40  ;;  %v2951_v2 = vpop.xlane.xlu1 %279 }
 0x100   :  { %v725_v3 = vsel %vm527_vm3, %v610_v1, %v591_v0  ;;  %v2954_v4 = vpop.xlane.xlu0 %276 }
 0x103   :  { %v190_v5 = vpop.xlane.xlu1 %189 }
 0x104   :  { %v181_v6 = vpop.xlane.xlu0 %180  ;;  %v233_v24 = vmul.f32 0.00390625, %v190_v5 }
 0x105   :  { %v230_v38 = vmul.f32 0.00390625, %v181_v6 }
 0x106   :  { %v501_v25 = vrot.slane %v233_v24, %v2893_v23 }
 0x107   :  { %v199_v7 = vpop.xlane.xlu1 %198  ;;  %v487_v40 = vrot.slane %v230_v38, %v2905_v50 }
 0x108   :  { %v196_v9 = vpop.xlane.xlu0 %195  ;;  %v236_v45 = vmul.f32 0.00390625, %v199_v7  ;;  %v502_v60 = vsel %vm385_vm1, %v501_v25, %v497_v58 }
 0x109   :  { %v235_v49 = vmul.f32 0.00390625, %v196_v9  ;;  %v488_v61 = vsel %vm392_vm2, %v487_v40, %v483_v53 }
 0x10a   :  { %v515_v48 = vrot.slane %v236_v45, %v2888_v12  ;;  %v536_v7 = vsel %vm535_vm7, %v488_v61, %v2945_v56 }
 0x10b   :  { %v2959_v13 = vpop.xlane.xlu1 %282  ;;  %v511_v55 = vrot.slane %v235_v49, %v2885_v14 }
 0x10c   :  { %v274_v16 = vpop.xlane.xlu0 %273  ;;  %v642_v56 = vrot.slane %v2959_v13, %v2893_v23 }
 0x10d   :  { %v628_v18 = vrot.slane %v274_v16, %v2905_v50  ;;  %v516_v0 = vsel %vm378_vm0, %v515_v48, %v511_v55 }
 0x10f   :  { %v629_v20 = vsel %vm392_vm2, %v628_v18, %v624_v19  ;;  %v2965_v21 = vpop.xlane.xlu1 %291  ;;  %v637_v18 = vrot.slane %v2951_v2, %v2888_v12  ;;  %v633_v19 = vrot.slane %v2954_v4, %v2885_v14 }
 0x110   :  { %v2968_v22 = vsel %vm529_vm4, %v629_v20, %v725_v3  ;;  %v2970_v26 = vpop.xlane.xlu0 %288 }
 0x113   :  { %v202_v27 = vpop.xlane.xlu1 %201 }
 0x114   :  { %v193_v28 = vpop.xlane.xlu0 %192  ;;  %v237_v43 = vmul.f32 0.00390625, %v202_v27  ;;  %v656_v27 = vrot.slane %v2965_v21, %v2888_v12 }
 0x115   :  { %v234_v31 = vmul.f32 0.00390625, %v193_v28  ;;  %v652_v28 = vrot.slane %v2970_v26, %v2885_v14  ;;  %v638_v26 = vsel %vm378_vm0, %v637_v18, %v633_v19  ;;  %v970_v19 = vsub.s32 3, %v2882_v8 }
 0x116   :  { %v520_v57 = vrot.slane %v237_v43, %v2893_v23 }
 0x117   :  { %v2972_v34 = vpop.xlane.xlu1 %294  ;;  %v506_v44 = vrot.slane %v234_v31, %v2905_v50  ;;  %v657_v30 = vsel %vm378_vm0, %v656_v27, %v652_v28  ;;  %v2371_v27 = vld [vmem:[#allocation5 + $0x4] ss:$8 sps:$4 sm:$0xff]   ;;  %v2369_v28 = vld [vmem:[#allocation5] ss:$8 sps:$4 sm:$0xff]  }
 0x118   :  { %v2974_v35 = vpop.xlane.xlu0 %285  ;;  %v521_v6 = vsel %vm385_vm1, %v520_v57, %v516_v0  ;;  %v661_v29 = vrot.slane %v2972_v34, %v2893_v23  ;;  %1884 = vmatprep.subr.bf16.mxu0 %v2371_v27  ;;  %v2449_v27 = vld [vmem:[#allocation5 + $0xd4] ss:$8 sps:$4 sm:$0xff]  }
 0x119   :  { %v507_v63 = vsel %vm392_vm2, %v506_v44, %v502_v60  ;;  %v647_v32 = vrot.slane %v2974_v35, %v2905_v50  ;;  %v643_v35 = vsel %vm385_vm1, %v642_v56, %v638_v26  ;;  %v2366_v56 = vld [vmem:[#allocation5 + $0x100] ss:$8 sps:$4 sm:$0xff]   ;;  %v2383_v26 = vld [vmem:[#allocation5 + $0x24] ss:$8 sps:$4 sm:$0xff]  }
 0x11a   :  { %v538_v10 = vsel %vm537_vm8, %v507_v63, %v536_v7  ;;  %v662_v45 = vsel %vm385_vm1, %v661_v29, %v657_v30  ;;  %v1027_v30 = vsub.s32 6, %v2882_v8 }
 0x11b   :  { %v2977_v51 = vpop.xlane.xlu1 %303  ;;  %v648_v49 = vsel %vm392_vm2, %v647_v32, %v643_v35  ;;  %v2374_v32 = vld [vmem:[#allocation5 + $0x114] ss:$8 sps:$4 sm:$0xff]  }
 0x11c   :  { %v301_v36 = vpop.xlane.xlu0 %300  ;;  %v675_v2 = vrot.slane %v2977_v51, %v2888_v12  ;;  %v727_v48 = vsel %vm531_vm5, %v648_v49, %v2968_v22  ;;  %v2387_v49 = vld [vmem:[#allocation5 + $0x30] ss:$8 sps:$4 sm:$0xff]  }
 0x11d   :  { %v671_v4 = vrot.slane %v301_v36, %v2885_v14 }
 0x11f   :  { %v298_v52 = vpop.xlane.xlu1 %297  ;;  %v676_v51 = vsel %vm378_vm0, %v675_v2, %v671_v4  ;;  %v2372_v2 = vld [vmem:[#allocation5 + $0x110] ss:$8 sps:$4 sm:$0xff]   ;;  %v2377_v4 = vld [vmem:[#allocation5 + $0x14] ss:$8 sps:$4 sm:$0xff]  }
 0x120   :  { %v205_v59 = vpop.xlane.xlu0 %204  ;;  %v666_v33 = vrot.slane %v298_v52, %v2905_v50 }
 0x121   :  { %v238_v62 = vmul.f32 0.00390625, %v205_v59 }
 0x122   :  { %v667_v46 = vsel %vm392_vm2, %v666_v33, %v662_v45  ;;  %v2375_v33 = vld [vmem:[#allocation5 + $0x10] ss:$8 sps:$4 sm:$0xff]   ;;  %v2389_v45 = vld [vmem:[#allocation5 + $0x34] ss:$8 sps:$4 sm:$0xff]  }
 0x123   :  { %v525_v1 = vrot.slane %v238_v62, %v2905_v50  ;;  %v313_v3 = vpop.xlane.xlu1 %312  ;;  %v728_v52 = vsel %vm533_vm6, %v667_v46, %v727_v48  ;;  %v2390_v46 = vld [vmem:[#allocation5 + $0x140] ss:$8 sps:$4 sm:$0xff]   ;;  %v2404_v48 = vld [vmem:[#allocation5 + $0x164] ss:$8 sps:$4 sm:$0xff]  }
 0x124   :  { %v307_v5 = vpop.xlane.xlu0 %306  ;;  %v690_v31 = vrot.slane %v313_v3, %v2885_v14 }
 0x125   :  { %v526_v9 = vsel %vm392_vm2, %v525_v1, %v521_v6  ;;  %v680_v13 = vrot.slane %v307_v5, %v2893_v23 }
 0x126   :  { %v540_v11 = vsel %vm539_vm9, %v526_v9, %v538_v10  ;;  %v3058_v9 = vsub.s32 0, %v2882_v8 }
 0x127   :  { %2340 = vmatprep.mubr.msk.f32.mxu0 %vm737_vm10, %v540_v11  ;;  %v310_v15 = vpop.xlane.xlu1 %309  ;;  %v681_v43 = vsel %vm385_vm1, %v680_v13, %v676_v51  ;;  %v989_v13 = vsub.s32 4, %v2882_v8 }
 0x128   :  { %v316_v16 = vpop.xlane.xlu0 %315  ;;  %v685_v24 = vrot.slane %v310_v15, %v2905_v50  ;;  %v3065_v15 = vsub.s32 1, %v2882_v8 }
 0x129   :  { %v694_v21 = vrot.slane %v316_v16, %v2888_v12  ;;  %v951_v16 = vsub.s32 2, %v2882_v8 }
 0x12a   :  { %v686_v25 = vsel %vm392_vm2, %v685_v24, %v681_v43  ;;  %v2381_v24 = vld [vmem:[#allocation5 + $0x20] ss:$8 sps:$4 sm:$0xff]   ;;  %v2395_v43 = vld [vmem:[#allocation5 + $0x44] ss:$8 sps:$4 sm:$0xff]  }
 0x12b   :  { %v325_v17 = vpop.xlane.xlu1 %324  ;;  %v695_v36 = vsel %vm378_vm0, %v694_v21, %v690_v31  ;;  %v729_v58 = vsel %vm535_vm7, %v686_v25, %v728_v52  ;;  %v2380_v21 = vld [vmem:[#allocation5 + $0x124] ss:$8 sps:$4 sm:$0xff]   ;;  %v2386_v31 = vld [vmem:[#allocation5 + $0x134] ss:$8 sps:$4 sm:$0xff]   ;;  %v2405_v52 = vld [vmem:[#allocation5 + $0x60] ss:$8 sps:$4 sm:$0xff]  }
 0x12c   :  { %v319_v20 = vpop.xlane.xlu0 %318  ;;  %v709_v40 = vrot.slane %v325_v17, %v2885_v14  ;;  %v2398_v25 = vld [vmem:[#allocation5 + $0x154] ss:$8 sps:$4 sm:$0xff]  }
 0x12d   :  { %v699_v34 = vrot.slane %v319_v20, %v2893_v23  ;;  %v2368_v20 = vld [vmem:[#allocation5 + $0x104] ss:$8 sps:$4 sm:$0xff]  }
 0x12f   :  { %v322_v42 = vpop.xlane.xlu1 %321  ;;  %v700_v41 = vsel %vm385_vm1, %v699_v34, %v695_v36  ;;  %v2393_v36 = vld [vmem:[#allocation5 + $0x40] ss:$8 sps:$4 sm:$0xff]  }
 0x130   :  { %v328_v38 = vpop.xlane.xlu0 %327  ;;  %v704_v39 = vrot.slane %v322_v42, %v2905_v50  ;;  %v2378_v42 = vld [vmem:[#allocation5 + $0x120] ss:$8 sps:$4 sm:$0xff]  }
 0x131   :  { %v713_v54 = vrot.slane %v328_v38, %v2888_v12  ;;  %v1008_v38 = vsub.s32 5, %v2882_v8 }
 0x132   :  { %v705_v12 = vsel %vm392_vm2, %v704_v39, %v700_v41  ;;  %v2384_v39 = vld [vmem:[#allocation5 + $0x130] ss:$8 sps:$4 sm:$0xff]   ;;  %v2401_v41 = vld [vmem:[#allocation5 + $0x54] ss:$8 sps:$4 sm:$0xff]  }
 0x133   :  { %v334_v37 = vpop.xlane.xlu1 %333  ;;  %v714_v53 = vsel %vm378_vm0, %v713_v54, %v709_v40  ;;  %v730_v59 = vsel %vm537_vm8, %v705_v12, %v729_v58  ;;  %v2392_v54 = vld [vmem:[#allocation5 + $0x144] ss:$8 sps:$4 sm:$0xff]   ;;  %v2396_v40 = vld [vmem:[#allocation5 + $0x150] ss:$8 sps:$4 sm:$0xff]   ;;  %v2402_v12 = vld [vmem:[#allocation5 + $0x160] ss:$8 sps:$4 sm:$0xff]  }
 0x134   :  { %v331_v44 = vpop.xlane.xlu0 %330  ;;  %v723_v47 = vrot.slane %v334_v37, %v2905_v50  ;;  %v1046_v37 = vsub.s32 7, %v2882_v8  ;;  %v2408_v58 = vld [vmem:[#allocation5 + $0x170] ss:$8 sps:$4 sm:$0xff]  }
 0x135   :  { %v718_v55 = vrot.slane %v331_v44, %v2893_v23  ;;  %v736_v23 = vld [vmem:[%s3655_s2] sm:$0x3]  ;;  %v2399_v44 = vld [vmem:[#allocation5 + $0x50] ss:$8 sps:$4 sm:$0xff]   ;;  %s2617_s2 = smov [#allocation7]  }
 0x136   :  { %2343 = vmatprep.subr.msk.mxu1 %vm826_vm11, %v736_v23  ;;  %s2241_s24 = sshll.u32 %s2617_s2, 4  ;;  %s2242_s24 = int_to_ptr.vmem [resolvable:$true] %s2241_s24 }
 0x137   :  { %v719_v14 = vsel %vm385_vm1, %v718_v55, %v714_v53  ;;  %2344 = vmatpush3.msk.msra.mxu1 %vm826_vm11, %v736_v23  ;;  %v2407_v55 = vld [vmem:[#allocation5 + $0x64] ss:$8 sps:$4 sm:$0xff]   ;;  %v2410_v53 = vld [vmem:[#allocation5 + $0x174] ss:$8 sps:$4 sm:$0xff]   ;;  %s2582_s27 = scalar_lea.vmem %s2242_s24, 8192  ;;  %p2587_p3 = scmp.lt.s32.totalorder %s2242_s24, %s2242_s24 }
 0x138   :  { %v724_v57 = vsel %vm392_vm2, %v723_v47, %v719_v14  ;;  %1925 = vmatprep.subr.bf16.mxu1 %v2368_v20  ;;  %v2413_v14 = vld [vmem:[#allocation5 + $0x74] ss:$8 sps:$4 sm:$0xff]   ;;  %v2419_v23 = vld [vmem:[#allocation5 + $0x84] ss:$8 sps:$4 sm:$0xff]   ;;  %p2583_p2 = scmp.ne.s32.totalorder %s2242_s24, %s2582_s27  ;;  %p2588_p4 = scmp.lt.s32.totalorder %s2582_s27, %s2582_s27 }
 0x139   :  { %v731_v50 = vsel %vm539_vm9, %v724_v57, %v730_v59  ;;  %v2411_v57 = vld [vmem:[#allocation5 + $0x70] ss:$8 sps:$4 sm:$0xff]   ;;  %v2416_v59 = vld [vmem:[#allocation5 + $0x184] ss:$8 sps:$4 sm:$0xff]   ;;  %v2446_v20 = vld [vmem:[#allocation5 + $0x1d4] ss:$8 sps:$4 sm:$0xff]  }
 0x13a   :  { %2341 = vmatmul.mubr.msk.f32.vlgmr.msra.gmra.mrb[0].mxu0 %vm737_vm10, %v731_v50  ;;  %v2414_v50 = vld [vmem:[#allocation5 + $0x180] ss:$8 sps:$4 sm:$0xff]   ;;  %p2589_p5 = por %p2588_p4, %p2587_p3 }
 0x13b   :  { %1885 = vmatpush1.bf16.msra.mxu0 %v2369_v28  ;;  %v2447_v28 = vld [vmem:[#allocation5 + $0xd0] ss:$8 sps:$4 sm:$0xff]  }
 0x13c   :  { %1886 = vmatprep.subr.bf16.mxu0 %v2377_v4  ;;  %v2453_v4 = vld [vmem:[#allocation5 + $0xe0] ss:$8 sps:$4 sm:$0xff]   ;;  %p2590_p6 = pnand %p2589_p5, %p2583_p2 }
 0x13f   :  { %1887 = vmatpush1.bf16.msra.mxu0 %v2375_v33  ;;  %v2458_v33 = vld [vmem:[#allocation5 + $0x1f4] ss:$8 sps:$4 sm:$0xff]  }
 0x140   :  { %1888 = vmatprep.subr.bf16.mxu0 %v2383_v26 }
 0x143   :  { %1889 = vmatpush1.bf16.msra.mxu0 %v2381_v24 }
 0x144   :  { %1890 = vmatprep.subr.bf16.mxu0 %v2389_v45  ;;  %v2475_v45 = vld [vmem:[#allocation2 + $0x18] sm:$0xff] }
 0x147   :  { %1891 = vmatpush1.bf16.msra.mxu0 %v2387_v49 }
 0x148   :  { %1892 = vmatprep.subr.bf16.mxu0 %v2395_v43 }
 0x14b   :  { %1893 = vmatpush1.bf16.msra.mxu0 %v2393_v36 }
 0x14c   :  { %1894 = vmatprep.subr.bf16.mxu0 %v2401_v41  ;;  %v2479_v41 = vld [vmem:[#allocation2 + $0x58] sm:$0xff] }
 0x14f   :  { %1895 = vmatpush1.bf16.msra.mxu0 %v2399_v44 }
 0x150   :  { %1896 = vmatprep.subr.bf16.mxu0 %v2407_v55 }
 0x153   :  { %1897 = vmatpush1.bf16.msra.mxu0 %v2405_v52  ;;  %v2481_v52 = vld [vmem:[#allocation2 + $0x28] sm:$0xff] }
 0x154   :  { %1898 = vmatprep.subr.bf16.mxu0 %v2413_v14 }
 0x157   :  { %1899 = vmatpush1.bf16.msra.mxu0 %v2411_v57  ;;  %v2482_v57 = vld [vmem:[#allocation2 + $0x40] sm:$0xff] }
 0x158   :  { %1900 = vmatprep.subr.bf16.mxu0 %v2419_v23 }
 0x20d   :  { %v2342_v22 = vpop.f32.mrb[0].mxu0 }
 0x20e   :  { %v808_v60 = vpop.f32.mrb[1].mxu0  ;;  %v818_v62 = vmax.f32 %v2342_v22, 0.0  ;;  %v2417_v22 = vld [vmem:[#allocation5 + $0x80] ss:$8 sps:$4 sm:$0xff]  }
 0x20f   :  { %v817_v61 = vmax.f32 %v808_v60, 0.0  ;;  %1901 = vmatpush1.bf16.msra.mxu0 %v2417_v22  ;;  %v2422_v60 = vld [vmem:[#allocation5 + $0x194] ss:$8 sps:$4 sm:$0xff]  }
 0x211   :  { %2345 = vmatprep.mubr.msk.f32.mxu1 %vm819_vm12, %v817_v61  ;;  %v2420_v61 = vld [vmem:[#allocation5 + $0x190] ss:$8 sps:$4 sm:$0xff]  }
 0x212   :  { %2346 = vmatmul.mubr.msk.f32.vlgmr.msra.gmra.mrb[0].mxu1 %vm819_vm12, %v818_v62  ;;  %v2425_v62 = vld [vmem:[#allocation5 + $0x94] ss:$8 sps:$4 sm:$0xff]  }
 0x213   :  { %1926 = vmatpush1.bf16.msra.mxu1 %v2366_v56  ;;  %1902 = vmatprep.subr.bf16.mxu0 %v2425_v62  ;;  %v2444_v56 = vld [vmem:[#allocation5 + $0x1d0] ss:$8 sps:$4 sm:$0xff]  }
 0x214   :  { %1927 = vmatprep.subr.bf16.mxu1 %v2374_v32  ;;  %v2450_v32 = vld [vmem:[#allocation5 + $0x1e0] ss:$8 sps:$4 sm:$0xff]  }
 0x217   :  { %1928 = vmatpush1.bf16.msra.mxu1 %v2372_v2  ;;  %v2455_v2 = vld [vmem:[#allocation5 + $0xe4] ss:$8 sps:$4 sm:$0xff]  }
 0x218   :  { %1929 = vmatprep.subr.bf16.mxu1 %v2380_v21  ;;  %v2459_v21 = vld [vmem:[#allocation5 + $0xf0] ss:$8 sps:$4 sm:$0xff]  }
 0x21b   :  { %1930 = vmatpush1.bf16.msra.mxu1 %v2378_v42  ;;  %v2461_v42 = vld [vmem:[#allocation5 + $0xf4] ss:$8 sps:$4 sm:$0xff]  }
 0x21c   :  { %1931 = vmatprep.subr.bf16.mxu1 %v2386_v31  ;;  %v2474_v31 = vld [vmem:[#allocation2 + $0x10] sm:$0xff] }
 0x21f   :  { %1932 = vmatpush1.bf16.msra.mxu1 %v2384_v39 }
 0x220   :  { %1933 = vmatprep.subr.bf16.mxu1 %v2392_v54 }
 0x223   :  { %1934 = vmatpush1.bf16.msra.mxu1 %v2390_v46  ;;  %v2477_v46 = vld [vmem:[#allocation2 + $0x8] sm:$0xff] }
 0x224   :  { %1935 = vmatprep.subr.bf16.mxu1 %v2398_v25  ;;  %v2478_v25 = vld [vmem:[#allocation2 + $0x50] sm:$0xff] }
 0x227   :  { %1936 = vmatpush1.bf16.msra.mxu1 %v2396_v40 }
 0x228   :  { %1937 = vmatprep.subr.bf16.mxu1 %v2404_v48 }
 0x22b   :  { %1938 = vmatpush1.bf16.msra.mxu1 %v2402_v12  ;;  %v2480_v12 = vld [vmem:[#allocation2 + $0x20] sm:$0xff] }
 0x22c   :  { %1939 = vmatprep.subr.bf16.mxu1 %v2410_v53 }
 0x22f   :  { %1940 = vmatpush1.bf16.msra.mxu1 %v2408_v58 }
 0x230   :  { %1941 = vmatprep.subr.bf16.mxu1 %v2416_v59 }
 0x233   :  { %1942 = vmatpush1.bf16.msra.mxu1 %v2414_v50  ;;  %v2483_v50 = vld [vmem:[#allocation2 + $0x48] sm:$0xff] }
 0x234   :  { %1943 = vmatprep.subr.bf16.mxu1 %v2422_v60 }
 0x237   :  { %1944 = vmatpush1.bf16.msra.mxu1 %v2420_v61  ;;  %v2484_v61 = vld [vmem:[#allocation2 + $0x80] sm:$0xff] }
 0x2e5   :  { %v2347_v63 = vpop.f32.mrb[0].mxu1 }
 0x2e6   :  { %v896_v0 = vpop.f32.mrb[1].mxu1 }
 0x2e7   :  { %v905_v1 = vadd.f32 %v2347_v63, %v896_v0  ;;  %v2423_v63 = vld [vmem:[#allocation5 + $0x90] ss:$8 sps:$4 sm:$0xff]   ;;  %v2428_v0 = vld [vmem:[#allocation5 + $0x1a4] ss:$8 sps:$4 sm:$0xff]  }
 0x2e8   :  { %1903 = vmatpush1.bf16.msra.mxu0 %v2423_v63  ;;  %1945 = vmatprep.subr.bf16.mxu1 %v2428_v0  ;;  %v2485_v63 = vld [vmem:[#allocation2 + $0x88] sm:$0xff] }
 0x2e9   :  { %v906_v3 = vsub.f32 0.0, %v905_v1  ;;  %v2426_v1 = vld [vmem:[#allocation5 + $0x1a0] ss:$8 sps:$4 sm:$0xff]  }
 0x2ea   :  { %1946 = vmatpush1.bf16.msra.mxu1 %v2426_v1  ;;  %v2486_v1 = vld [vmem:[#allocation2 + $0x90] sm:$0xff] }
 0x2eb   :  { %v907_v5 = vmul.f32 1.442695, %v906_v3  ;;  %v2431_v3 = vld [vmem:[#allocation5 + $0xa4] ss:$8 sps:$4 sm:$0xff]  }
 0x2ec   :  { %1904 = vmatprep.subr.bf16.mxu0 %v2431_v3 }
 0x2ed   :  { %2462 = vpow2.f32 %v907_v5  ;;  %v2429_v5 = vld [vmem:[#allocation5 + $0xa0] ss:$8 sps:$4 sm:$0xff]  }
 0x2ee   :  { %1905 = vmatpush1.bf16.msra.mxu0 %v2429_v5  ;;  %v2487_v5 = vld [vmem:[#allocation2 + $0x98] sm:$0xff] }
 0x2f7   :  { %v2463_v6 = vpop.eup %2462 }
 0x2f8   :  { %v909_v7 = vadd.f32 1.0, %v2463_v6  ;;  %v2434_v6 = vld [vmem:[#allocation5 + $0x1b4] ss:$8 sps:$4 sm:$0xff]  }
 0x2f9   :  { %1947 = vmatprep.subr.bf16.mxu1 %v2434_v6 }
 0x2fa   :  { %2464 = vrcp.f32 %v909_v7  ;;  %v2432_v7 = vld [vmem:[#allocation5 + $0x1b0] ss:$8 sps:$4 sm:$0xff]  }
 0x2fb   :  { %1948 = vmatpush1.bf16.msra.mxu1 %v2432_v7 }
 0x304   :  { %v3060_v10 = vpop.eup %2464 }
 0x305   :  { %v914_v11 = vrot.slane %v3060_v10, %v3058_v9  ;;  %v933_v17 = vrot.slane %v3060_v10, %v3065_v15  ;;  %v952_v18 = vrot.slane %v3060_v10, %v951_v16  ;;  %v971_v29 = vrot.slane %v3060_v10, %v970_v19  ;;  %v2440_v16 = vld [vmem:[#allocation5 + $0x1c4] ss:$8 sps:$4 sm:$0xff]   ;;  %v2441_v19 = vld [vmem:[#allocation5 + $0xc0] ss:$8 sps:$4 sm:$0xff]  }
 0x306   :  { %v990_v34 = vrot.slane %v3060_v10, %v989_v13  ;;  %v1009_v35 = vrot.slane %v3060_v10, %v1008_v38  ;;  %v1028_v51 = vrot.slane %v3060_v10, %v1027_v30  ;;  %v1047_v47 = vrot.slane %v3060_v10, %v1046_v37  ;;  %v2437_v10 = vld [vmem:[#allocation5 + $0xb4] ss:$8 sps:$4 sm:$0xff]   ;;  %1949 = vmatprep.subr.bf16.mxu1 %v2440_v16  ;;  %v2456_v13 = vld [vmem:[#allocation5 + $0x1f0] ss:$8 sps:$4 sm:$0xff]  }
 0x307   :  { %920 = vbcast.lane.b32.xlu1 %v914_v11, 264  ;;  %916 = vbcast.lane.b32.xlu0 %v914_v11, 256 }
 0x308   :  { %1906 = vmatprep.subr.bf16.mxu0 %v2437_v10 }
 0x30b   :  { %935 = vbcast.lane.b32.xlu1 %v933_v17, 256  ;;  %954 = vbcast.lane.b32.xlu0 %v952_v18, 256 }
 0x30f   :  { %939 = vbcast.lane.b32.xlu1 %v933_v17, 264  ;;  %924 = vbcast.lane.b32.xlu0 %v914_v11, 272 }
 0x313   :  { %958 = vbcast.lane.b32.xlu1 %v952_v18, 264  ;;  %973 = vbcast.lane.b32.xlu0 %v971_v29, 256 }
 0x317   :  { %943 = vbcast.lane.b32.xlu1 %v933_v17, 272  ;;  %962 = vbcast.lane.b32.xlu0 %v952_v18, 272 }
 0x31b   :  { %977 = vbcast.lane.b32.xlu1 %v971_v29, 264  ;;  %996 = vbcast.lane.b32.xlu0 %v990_v34, 264 }
 0x31f   :  { %992 = vbcast.lane.b32.xlu1 %v990_v34, 256  ;;  %947 = vbcast.lane.b32.xlu0 %v933_v17, 280  ;;  %v2438_v17 = vld [vmem:[#allocation5 + $0x1c0] ss:$8 sps:$4 sm:$0xff]  }
 0x320   :  { %1950 = vmatpush1.bf16.msra.mxu1 %v2438_v17 }
 0x321   :  { %1951 = vmatprep.subr.bf16.mxu1 %v2446_v20 }
 0x323   :  { %928 = vbcast.lane.b32.xlu1 %v914_v11, 280  ;;  %1011 = vbcast.lane.b32.xlu0 %v1009_v35, 256  ;;  %v2435_v11 = vld [vmem:[#allocation5 + $0xb0] ss:$8 sps:$4 sm:$0xff]  }
 0x324   :  { %1907 = vmatpush1.bf16.msra.mxu0 %v2435_v11  ;;  %1952 = vmatpush1.bf16.msra.mxu1 %v2444_v56  ;;  %v2489_v56 = vld [vmem:[#allocation2 + $0x68] sm:$0xff] }
 0x327   :  { %981 = vbcast.lane.b32.xlu1 %v971_v29, 272  ;;  %966 = vbcast.lane.b32.xlu0 %v952_v18, 280  ;;  %v2443_v18 = vld [vmem:[#allocation5 + $0xc4] ss:$8 sps:$4 sm:$0xff]  }
 0x328   :  { %1908 = vmatprep.subr.bf16.mxu0 %v2443_v18 }
 0x329   :  { %1909 = vmatpush1.bf16.msra.mxu0 %v2441_v19  ;;  %v2488_v19 = vld [vmem:[#allocation2 + $0x60] sm:$0xff] }
 0x32a   :  { %1910 = vmatprep.subr.bf16.mxu0 %v2449_v27 }
 0x32b   :  { %1015 = vbcast.lane.b32.xlu1 %v1009_v35, 264  ;;  %1030 = vbcast.lane.b32.xlu0 %v1028_v51, 256 }
 0x32d   :  { %1911 = vmatpush1.bf16.msra.mxu0 %v2447_v28 }
 0x32e   :  { %1912 = vmatprep.subr.bf16.mxu0 %v2455_v2 }
 0x32f   :  { %1000 = vbcast.lane.b32.xlu1 %v990_v34, 272  ;;  %985 = vbcast.lane.b32.xlu0 %v971_v29, 280  ;;  %v2452_v29 = vld [vmem:[#allocation5 + $0x1e4] ss:$8 sps:$4 sm:$0xff]  }
 0x330   :  { %1953 = vmatprep.subr.bf16.mxu1 %v2452_v29 }
 0x331   :  { %1954 = vmatpush1.bf16.msra.mxu1 %v2450_v32  ;;  %1913 = vmatpush1.bf16.msra.mxu0 %v2453_v4  ;;  %v2490_v32 = vld [vmem:[#allocation2 + $0xa0] sm:$0xff]  ;;  %v2491_v4 = vld [vmem:[#allocation2 + $0xa8] sm:$0xff] }
 0x332   :  { %1955 = vmatprep.subr.bf16.mxu1 %v2458_v33  ;;  %1914 = vmatprep.subr.bf16.mxu0 %v2461_v42 }
 0x333   :  { %1034 = vbcast.lane.b32.xlu1 %v1028_v51, 264  ;;  %1049 = vbcast.lane.b32.xlu0 %v1047_v47, 256 }
 0x335   :  { %1956 = vmatpush1.bf16.msra.mxu1 %v2456_v13  ;;  %1915 = vmatpush1.bf16.msra.mxu0 %v2459_v21 }
 0x337   :  { %1019 = vbcast.lane.b32.xlu1 %v1009_v35, 272  ;;  %1004 = vbcast.lane.b32.xlu0 %v990_v34, 280 }
 0x33b   :  { %1053 = vbcast.lane.b32.xlu1 %v1047_v47, 264  ;;  %1023 = vbcast.lane.b32.xlu0 %v1009_v35, 280 }
 0x33f   :  { %1038 = vbcast.lane.b32.xlu1 %v1028_v51, 272  ;;  %1042 = vbcast.lane.b32.xlu0 %v1028_v51, 280  ;;  %v2476_v51 = vld [vmem:[#allocation2] sm:$0xff] }
 0x343   :  { %1057 = vbcast.lane.b32.xlu1 %v1047_v47, 272 }
 0x347   :  { %1061 = vbcast.lane.b32.xlu1 %v1047_v47, 280 }
 0x379   :  { %v921_v26 = vpop.permute.xlu1 %920  ;;  %v917_v24 = vpop.permute.xlu0 %916 }
 0x37a   :  { %v3081_v39 = vmul.f32 %v2474_v31, %v921_v26  ;;  %v3083_v49 = vmul.f32 %v2475_v45, %v921_v26  ;;  %v3085_v54 = vmul.f32 %v2476_v51, %v917_v24  ;;  %v3087_v43 = vmul.f32 %v2477_v46, %v917_v24  ;;  %v2492_v24 = vld [vmem:[#allocation2 + $0xc0] sm:$0xff]  ;;  %v2494_v45 = vld [vmem:[#allocation2 + $0xd0] sm:$0xff]  ;;  %v2495_v46 = vld [vmem:[#allocation2 + $0xd8] sm:$0xff] }
 0x37c   :  { %3710 = vst [vmem:[#allocation11_spill] sm:$0xff] %v3083_v49  ;;  %v1127_v47 = vadd.f32 %v3081_v39, %v3085_v54  ;;  %v1136_v48 = vadd.f32 %v3083_v49, %v3087_v43  ;;  %v1288_v58 = vmax.f32 %v3085_v54, %v3081_v39  ;;  %v1297_v14 = vmax.f32 %v3087_v43, %v3083_v49 }
 0x37d   :  { %v936_v34 = vpop.permute.xlu1 %935  ;;  %v955_v38 = vpop.permute.xlu0 %954 }
 0x37e   :  { %v3105_v59 = vmul.f32 %v2482_v57, %v936_v34  ;;  %v3107_v23 = vmul.f32 %v2483_v50, %v936_v34  ;;  %v3109_v62 = vmul.f32 %v2484_v61, %v955_v38  ;;  %v3111_v0 = vmul.f32 %v2485_v63, %v955_v38  ;;  %v2493_v38 = vld [vmem:[#allocation2 + $0xc8] sm:$0xff] }
 0x37f   :  { %v2499_v63 = vld [vmem:[#allocation2 + $0x108] sm:$0xff] }
 0x380   :  { %3715 = vst [vmem:[#allocation16_spill] sm:$0xff] %v3105_v59  ;;  %3716 = vst [vmem:[#allocation17_spill] sm:$0xff] %v3107_v23 }
 0x381   :  { %v940_v35 = vpop.permute.xlu1 %939  ;;  %v925_v30 = vpop.permute.xlu0 %924  ;;  %3717 = vst [vmem:[#allocation18_spill] sm:$0xff] %v3109_v62  ;;  %3718 = vst [vmem:[#allocation19_spill] sm:$0xff] %v3111_v0 }
 0x382   :  { %v3089_v40 = vmul.f32 %v2478_v25, %v940_v35  ;;  %v3091_v44 = vmul.f32 %v2479_v41, %v940_v35  ;;  %v3097_v55 = vmul.f32 %v2480_v12, %v925_v30  ;;  %v3099_v53 = vmul.f32 %v2481_v52, %v925_v30  ;;  %v2496_v52 = vld [vmem:[#allocation2 + $0x110] sm:$0xff] }
 0x384   :  { %3711 = vst [vmem:[#allocation12_spill] sm:$0xff] %v3089_v40  ;;  %3712 = vst [vmem:[#allocation13_spill] sm:$0xff] %v3091_v44  ;;  %v1145_v7 = vadd.f32 %v3089_v40, %v3105_v59  ;;  %v1154_v10 = vadd.f32 %v3091_v44, %v3107_v23  ;;  %v1306_v11 = vmax.f32 %v3105_v59, %v3089_v40 }
 0x385   :  { %v959_v36 = vpop.permute.xlu1 %958  ;;  %v974_v37 = vpop.permute.xlu0 %973  ;;  %3713 = vst [vmem:[#allocation14_spill] sm:$0xff] %v3097_v55  ;;  %3714 = vst [vmem:[#allocation15_spill] sm:$0xff] %v3099_v53  ;;  %v1315_v16 = vmax.f32 %v3107_v23, %v3091_v44  ;;  %v3126_v17 = vadd.f32 %v1127_v47, %v3097_v55  ;;  %v3129_v18 = vadd.f32 %v1136_v48, %v3099_v53 }
 0x386   :  { %v3113_v3 = vmul.f32 %v2486_v1, %v959_v36  ;;  %v3115_v6 = vmul.f32 %v2487_v5, %v959_v36  ;;  %v3136_v28 = vmax.f32 %v1288_v58, %v3097_v55  ;;  %v3139_v29 = vmax.f32 %v1297_v14, %v3099_v53  ;;  %v2497_v14 = vld [vmem:[#allocation2 + $0x118] sm:$0xff]  ;;  %v2500_v5 = vld [vmem:[#allocation2 + $0x70] sm:$0xff] }
 0x387   :  { %v3149_v34 = vmul.f32 %v2492_v24, %v974_v37  ;;  %v3151_v35 = vmul.f32 %v2493_v38, %v974_v37 }
 0x388   :  { %3719 = vst [vmem:[#allocation20_spill] sm:$0xff] %v3113_v3  ;;  %3720 = vst [vmem:[#allocation21_spill] sm:$0xff] %v3115_v6  ;;  %v1163_v42 = vadd.f32 %v3113_v3, %v3109_v62  ;;  %v1172_v26 = vadd.f32 %v3115_v6, %v3111_v0  ;;  %v1324_v30 = vmax.f32 %v3109_v62, %v3113_v3 }
 0x389   :  { %v944_v22 = vpop.permute.xlu1 %943  ;;  %v963_v60 = vpop.permute.xlu0 %962  ;;  %3725 = vst [vmem:[#allocation26_spill] sm:$0xff] %v3149_v34  ;;  %3726 = vst [vmem:[#allocation27_spill] sm:$0xff] %v3151_v35  ;;  %v1333_v31 = vmax.f32 %v3111_v0, %v3115_v6 }
 0x38a   :  { %v3131_v20 = vmul.f32 %v2488_v19, %v944_v22  ;;  %v3133_v27 = vmul.f32 %v2489_v56, %v944_v22  ;;  %v3141_v2 = vmul.f32 %v2490_v32, %v963_v60  ;;  %v3143_v33 = vmul.f32 %v2491_v4, %v963_v60  ;;  %v2498_v60 = vld [vmem:[#allocation2 + $0x100] sm:$0xff] }
 0x38c   :  { %3721 = vst [vmem:[#allocation22_spill] sm:$0xff] %v3131_v20  ;;  %3722 = vst [vmem:[#allocation23_spill] sm:$0xff] %v3133_v27  ;;  %v1146_v25 = vadd.f32 %v1145_v7, %v3131_v20  ;;  %v1155_v41 = vadd.f32 %v1154_v10, %v3133_v27  ;;  %v1307_v47 = vmax.f32 %v1306_v11, %v3131_v20  ;;  %v2501_v10 = vld [vmem:[#allocation2 + $0x78] sm:$0xff] }
 0x38d   :  { %3723 = vst [vmem:[#allocation24_spill] sm:$0xff] %v3141_v2  ;;  %3724 = vst [vmem:[#allocation25_spill] sm:$0xff] %v3143_v33  ;;  %v978_v13 = vpop.permute.xlu1 %977  ;;  %v997_v21 = vpop.permute.xlu0 %996  ;;  %v1316_v37 = vmax.f32 %v1315_v16, %v3133_v27  ;;  %v3166_v48 = vadd.f32 %v1163_v42, %v3141_v2  ;;  %v3169_v12 = vadd.f32 %v1172_v26, %v3143_v33 }
 0x38e   :  { %v3157_v51 = vmul.f32 %v2494_v45, %v978_v13  ;;  %v3159_v36 = vmul.f32 %v2495_v46, %v978_v13  ;;  %v3171_v58 = vmul.f32 %v2496_v52, %v997_v21  ;;  %v3173_v57 = vmul.f32 %v2497_v14, %v997_v21  ;;  %v2502_v52 = vld [vmem:[#allocation2 + $0x30] sm:$0xff] }
 0x38f   :  { %v3184_v16 = vmax.f32 %v1324_v30, %v3141_v2  ;;  %v3187_v19 = vmax.f32 %v1333_v31, %v3143_v33 }
 0x390   :  { %3727 = vst [vmem:[#allocation28_spill] sm:$0xff] %v3157_v51  ;;  %3728 = vst [vmem:[#allocation29_spill] sm:$0xff] %v3159_v36  ;;  %v3191_v56 = vadd.f32 %v3157_v51, %v3149_v34  ;;  %v3195_v32 = vadd.f32 %v3159_v36, %v3151_v35 }
 0x391   :  { %3729 = vst [vmem:[#allocation30_spill] sm:$0xff] %v3171_v58  ;;  %3730 = vst [vmem:[#allocation31_spill] sm:$0xff] %v3173_v57  ;;  %v993_v50 = vpop.permute.xlu1 %992  ;;  %v948_v22 = vpop.permute.xlu0 %947 }
 0x392   :  { %v3175_v61 = vmul.f32 %v2498_v60, %v993_v50  ;;  %v3177_v1 = vmul.f32 %v2499_v63, %v993_v50  ;;  %v3179_v7 = vmul.f32 %v2500_v5, %v948_v22  ;;  %v3181_v11 = vmul.f32 %v2501_v10, %v948_v22  ;;  %v2503_v50 = vld [vmem:[#allocation2 + $0x38] sm:$0xff] }
 0x394   :  { %3731 = vst [vmem:[#allocation32_spill] sm:$0xff] %v3175_v61  ;;  %3732 = vst [vmem:[#allocation33_spill] sm:$0xff] %v3177_v1  ;;  %v3203_v21 = vadd.f32 %v3171_v58, %v3175_v61  ;;  %v3207_v42 = vadd.f32 %v3173_v57, %v3177_v1  ;;  %v1147_v26 = vadd.f32 %v1146_v25, %v3179_v7 }
 0x395   :  { %3733 = vst [vmem:[#allocation34_spill] sm:$0xff] %v3179_v7  ;;  %3734 = vst [vmem:[#allocation35_spill] sm:$0xff] %v3181_v11  ;;  %v1156_v24 = vadd.f32 %v1155_v41, %v3181_v11  ;;  %v1308_v38 = vmax.f32 %v1307_v47, %v3179_v7  ;;  %v1317_v30 = vmax.f32 %v1316_v37, %v3181_v11  ;;  %v929_v31 = vpop.permute.xlu1 %928  ;;  %v1012_v47 = vpop.permute.xlu0 %1011 }
 0x396   :  { %v3217_v14 = vmul.f32 %v2502_v52, %v929_v31  ;;  %v3219_v22 = vmul.f32 %v2503_v50, %v929_v31  ;;  %v1148_v25 = vrot.slane %v1147_v26, 4 }
 0x397   :  { %v1157_v60 = vrot.slane %v1156_v24, 4  ;;  %v1309_v41 = vrot.slane %v1308_v38, 4  ;;  %v1318_v63 = vrot.slane %v1317_v30, 4 }
 0x398   :  { %3735 = vst [vmem:[#allocation36_spill] sm:$0xff] %v3217_v14  ;;  %3736 = vst [vmem:[#allocation37_spill] sm:$0xff] %v3219_v22  ;;  %v1129_v37 = vadd.f32 %v3126_v17, %v3217_v14  ;;  %v1138_v5 = vadd.f32 %v3129_v18, %v3219_v22  ;;  %v1290_v10 = vmax.f32 %v3136_v28, %v3217_v14 }
 0x399   :  { %v1299_v52 = vmax.f32 %v3139_v29, %v3219_v22  ;;  %v1149_v46 = vadd.f32 %v1148_v25, %v1147_v26  ;;  %v1158_v31 = vadd.f32 %v1157_v60, %v1156_v24  ;;  %v1310_v50 = vmax.f32 %v1308_v38, %v1309_v41  ;;  %v982_v28 = vpop.permute.xlu1 %981  ;;  %v967_v24 = vpop.permute.xlu0 %966 }
 0x39a   :  { %v1319_v45 = vmax.f32 %v1317_v30, %v1318_v63  ;;  %v1130_v13 = vrot.slane %v1129_v37, 4  ;;  %v1139_v4 = vrot.slane %v1138_v5, 4  ;;  %v1291_v33 = vrot.slane %v1290_v10, 4 }
 0x39b   :  { %v1300_v2 = vrot.slane %v1299_v52, 4  ;;  %v1150_v6 = vrot.slane %v1149_v46, 2  ;;  %v1159_v3 = vrot.slane %v1158_v31, 2  ;;  %v1311_v17 = vrot.slane %v1310_v50, 2 }
 0x39c   :  { %v1320_v0 = vrot.slane %v1319_v45, 2  ;;  %v1131_v62 = vadd.f32 %v1130_v13, %v1129_v37  ;;  %v1140_v18 = vadd.f32 %v1139_v4, %v1138_v5  ;;  %v1292_v11 = vmax.f32 %v1290_v10, %v1291_v33  ;;  %v2504_v37 = vld [vmem:[#allocation2 + $0x140] sm:$0xff] }
 0x39d   :  { %v1301_v7 = vmax.f32 %v1299_v52, %v1300_v2  ;;  %v1151_v27 = vadd.f32 %v1150_v6, %v1149_v46  ;;  %v1160_v20 = vadd.f32 %v1159_v3, %v1158_v31  ;;  %v1312_v29 = vmax.f32 %v1310_v50, %v1311_v17  ;;  %v2505_v3 = vld [vmem:[#allocation2 + $0x148] sm:$0xff]  ;;  %v1016_v52 = vpop.permute.xlu1 %1015  ;;  %v2506_v17 = vld [vmem:[#allocation2 + $0xe0] sm:$0xff] }
 0x39e   :  { %v1321_v26 = vmax.f32 %v1319_v45, %v1320_v0  ;;  %v1132_v38 = vrot.slane %v1131_v62, 2  ;;  %v1141_v30 = vrot.slane %v1140_v18, 2  ;;  %v1293_v25 = vrot.slane %v1292_v11, 2 }
 0x39f   :  { %v1302_v60 = vrot.slane %v1301_v7, 2  ;;  %v1152_v41 = vrot.slane %v1151_v27, 1  ;;  %v1161_v63 = vrot.slane %v1160_v20, 1  ;;  %v1313_v44 = vrot.slane %v1312_v29, 1 }
 0x3a0   :  { %v1322_v40 = vrot.slane %v1321_v26, 1  ;;  %v1133_v23 = vadd.f32 %v1132_v38, %v1131_v62  ;;  %v1142_v59 = vadd.f32 %v1141_v30, %v1140_v18  ;;  %v1294_v13 = vmax.f32 %v1292_v11, %v1293_v25  ;;  %v2507_v11 = vld [vmem:[#allocation2 + $0xe8] sm:$0xff] }
 0x3a1   :  { %v1303_v4 = vmax.f32 %v1301_v7, %v1302_v60  ;;  %v1153_v33 = vadd.f32 %v1152_v41, %v1151_v27  ;;  %v1162_v2 = vadd.f32 %v1161_v63, %v1160_v20  ;;  %v3229_v6 = vmul.f32 %v2504_v37, %v1012_v47  ;;  %v1031_v20 = vpop.permute.xlu0 %1030  ;;  %v2508_v41 = vld [vmem:[#allocation2 + $0xb0] sm:$0xff] }
 0x3a2   :  { %v3231_v0 = vmul.f32 %v2505_v3, %v1012_v47  ;;  %v1134_v45 = vrot.slane %v1133_v23, 1  ;;  %v1143_v46 = vrot.slane %v1142_v59, 1  ;;  %v1295_v5 = vrot.slane %v1294_v13, 1 }
 0x3a3   :  { %3737 = vst [vmem:[#allocation38_spill] sm:$0xff] %v3229_v6  ;;  %v1304_v10 = vrot.slane %v1303_v4, 1  ;;  %v1314_v31 = vmax.f32 %v1312_v29, %v1313_v44  ;;  %v1323_v50 = vmax.f32 %v1321_v26, %v1322_v40  ;;  %v3233_v62 = vmul.f32 %v2506_v17, %v982_v28 }
 0x3a4   :  { %3738 = vst [vmem:[#allocation39_spill] sm:$0xff] %v3231_v0  ;;  %v3235_v7 = vmul.f32 %v2507_v11, %v982_v28  ;;  %v1135_v27 = vadd.f32 %v1134_v45, %v1133_v23  ;;  %v1144_v18 = vadd.f32 %v1143_v46, %v1142_v59  ;;  %v1296_v38 = vmax.f32 %v1294_v13, %v1295_v5  ;;  %v2509_v13 = vld [vmem:[#allocation2 + $0xb8] sm:$0xff] }
 0x3a5   :  { %3739 = vst [vmem:[#allocation40_spill] sm:$0xff] %v3233_v62  ;;  %v1305_v30 = vmax.f32 %v1303_v4, %v1304_v10  ;;  %v1274_v47 = vmul.f32 0.03125, %v1153_v33  ;;  %v1275_v25 = vmul.f32 0.03125, %v1162_v2  ;;  %v1182_v60 = vadd.f32 %v3191_v56, %v3233_v62  ;;  %v2510_v4 = vld [vmem:[#allocation2 + $0x150] sm:$0xff]  ;;  %v2511_v33 = vld [vmem:[#allocation2 + $0x158] sm:$0xff]  ;;  %v986_v11 = vpop.permute.xlu0 %985 }
 0x3a6   :  { %3740 = vst [vmem:[#allocation41_spill] sm:$0xff] %v3235_v7  ;;  %v1191_v44 = vadd.f32 %v3195_v32, %v3235_v7  ;;  %v1272_v40 = vmul.f32 0.03125, %v1135_v27  ;;  %v1273_v29 = vmul.f32 0.03125, %v1144_v18  ;;  %v3741_v28 = vmax.f32 %v3149_v34, %v3157_v51  ;;  %v2512_v27 = vld [vmem:[#allocation2 + $0x180] sm:$0xff]  ;;  %v2513_v18 = vld [vmem:[#allocation2 + $0x188] sm:$0xff] }
 0x3a7   :  { %v3742_v59 = vmax.f32 %v3151_v35, %v3159_v36  ;;  %v3249_v63 = vmul.f32 %v2508_v41, %v967_v24  ;;  %v3251_v56 = vmul.f32 %v2509_v13, %v967_v24  ;;  %v3253_v32 = vmul.f32 %v2510_v4, %v1016_v52  ;;  %v1001_v24 = vpop.permute.xlu1 %1000  ;;  %v2517_v41 = vld [vmem:[#allocation2 + $0xf8] sm:$0xff] }
 0x3a8   :  { %v1343_v26 = vmax.f32 %v3741_v28, %v3233_v62  ;;  %v3255_v2 = vmul.f32 %v2511_v33, %v1016_v52  ;;  %v3258_v37 = vsel %vm527_vm3, %v1274_v47, %v1272_v40  ;;  %v3261_v3 = vsel %vm527_vm3, %v1275_v25, %v1273_v29  ;;  %v2515_v40 = vld [vmem:[#allocation2 + $0x128] sm:$0xff]  ;;  %v2516_v28 = vld [vmem:[#allocation2 + $0xf0] sm:$0xff] }
 0x3a9   :  { %v1352_v23 = vmax.f32 %v3742_v59, %v3235_v7  ;;  %3743 = vst [vmem:[#allocation42_spill] sm:$0xff] %v3249_v63  ;;  %3744 = vst [vmem:[#allocation43_spill] sm:$0xff] %v3251_v56  ;;  %v3264_v45 = vsel %vm527_vm3, %v1314_v31, %v1296_v38  ;;  %v3267_v46 = vsel %vm527_vm3, %v1323_v50, %v1305_v30  ;;  %v1050_v22 = vpop.permute.xlu0 %1049 }
 0x3aa   :  { %3745 = vst [vmem:[#allocation44_spill] sm:$0xff] %v3253_v32  ;;  %3746 = vst [vmem:[#allocation45_spill] sm:$0xff] %v3255_v2  ;;  %v1165_v5 = vadd.f32 %v3166_v48, %v3249_v63  ;;  %v1174_v10 = vadd.f32 %v3169_v12, %v3251_v56  ;;  %v1326_v52 = vmax.f32 %v3184_v16, %v3249_v63 }
 0x3ab   :  { %v1335_v17 = vmax.f32 %v3187_v19, %v3251_v56  ;;  %v3279_v31 = vadd.f32 %v3253_v32, %v3229_v6  ;;  %v3283_v50 = vadd.f32 %v3255_v2, %v3231_v0  ;;  %v3285_v48 = vmul.f32 %v2512_v27, %v1031_v20  ;;  %v2514_v19 = vld [vmem:[#allocation2 + $0x120] sm:$0xff] }
 0x3ac   :  { %v3287_v12 = vmul.f32 %v2513_v18, %v1031_v20  ;;  %v1166_v38 = vrot.slane %v1165_v5, 4  ;;  %v1175_v16 = vrot.slane %v1174_v10, 4  ;;  %v1327_v30 = vrot.slane %v1326_v52, 4 }
 0x3ad   :  { %v1336_v47 = vrot.slane %v1335_v17, 4  ;;  %v3289_v25 = vmul.f32 %v2514_v19, %v1001_v24  ;;  %v3291_v29 = vmul.f32 %v2515_v40, %v1001_v24  ;;  %v3293_v59 = vmul.f32 %v2516_v28, %v986_v11 }
 0x3ae   :  { %v3295_v13 = vmul.f32 %v2517_v41, %v986_v11  ;;  %v1167_v4 = vadd.f32 %v1166_v38, %v1165_v5  ;;  %v1176_v33 = vadd.f32 %v1175_v16, %v1174_v10  ;;  %v1328_v20 = vmax.f32 %v1326_v52, %v1327_v30  ;;  %v1035_v11 = vpop.permute.xlu1 %1034 }
 0x3af   :  { %3747 = vst [vmem:[#allocation46_spill] sm:$0xff] %v3289_v25  ;;  %3748 = vst [vmem:[#allocation47_spill] sm:$0xff] %v3291_v29  ;;  %v1337_v27 = vmax.f32 %v1335_v17, %v1336_v47  ;;  %v3303_v24 = vadd.f32 %v3203_v21, %v3289_v25  ;;  %v3307_v40 = vadd.f32 %v3207_v42, %v3291_v29 }
 0x3b0   :  { %3749 = vst [vmem:[#allocation48_spill] sm:$0xff] %v3293_v59  ;;  %3750 = vst [vmem:[#allocation49_spill] sm:$0xff] %v3295_v13  ;;  %v1168_v28 = vrot.slane %v1167_v4, 2  ;;  %v1177_v5 = vrot.slane %v1176_v33, 2  ;;  %v1329_v10 = vrot.slane %v1328_v20, 2  ;;  %v1183_v17 = vadd.f32 %v1182_v60, %v3293_v59 }
 0x3b1   :  { %v1338_v52 = vrot.slane %v1337_v27, 2  ;;  %v1192_v38 = vadd.f32 %v1191_v44, %v3295_v13  ;;  %v1344_v16 = vmax.f32 %v1343_v26, %v3293_v59  ;;  %v1353_v30 = vmax.f32 %v1352_v23, %v3295_v13 }
 0x3b2   :  { %v1169_v47 = vadd.f32 %v1168_v28, %v1167_v4  ;;  %v1178_v21 = vadd.f32 %v1177_v5, %v1176_v33  ;;  %v1330_v41 = vmax.f32 %v1328_v20, %v1329_v10  ;;  %v1184_v18 = vrot.slane %v1183_v17, 4  ;;  %v1020_v26 = vpop.permute.xlu1 %1019 }
 0x3b3   :  { %v1339_v19 = vmax.f32 %v1337_v27, %v1338_v52  ;;  %v1193_v42 = vrot.slane %v1192_v38, 4  ;;  %v1345_v7 = vrot.slane %v1344_v16, 4  ;;  %v1354_v62 = vrot.slane %v1353_v30, 4 }
 0x3b4   :  { %v1170_v36 = vrot.slane %v1169_v47, 1  ;;  %v1179_v51 = vrot.slane %v1178_v21, 1  ;;  %v1331_v35 = vrot.slane %v1330_v41, 1  ;;  %v1185_v56 = vadd.f32 %v1184_v18, %v1183_v17 }
 0x3b5   :  { %v1340_v34 = vrot.slane %v1339_v19, 1  ;;  %v1194_v60 = vadd.f32 %v1193_v42, %v1192_v38  ;;  %v1346_v63 = vmax.f32 %v1344_v16, %v1345_v7  ;;  %v1355_v44 = vmax.f32 %v1353_v30, %v1354_v62  ;;  %v1005_v42 = vpop.permute.xlu0 %1004 }
 0x3b6   :  { %v1171_v59 = vadd.f32 %v1170_v36, %v1169_v47  ;;  %v1180_v23 = vadd.f32 %v1179_v51, %v1178_v21  ;;  %v1332_v4 = vmax.f32 %v1330_v41, %v1331_v35  ;;  %v3751_v33 = vmax.f32 %v3175_v61, %v3171_v58  ;;  %v2518_v36 = vld [vmem:[#allocation2 + $0x190] sm:$0xff] }
 0x3b7   :  { %v1186_v27 = vrot.slane %v1185_v56, 2  ;;  %v1195_v28 = vrot.slane %v1194_v60, 2  ;;  %v1347_v5 = vrot.slane %v1346_v63, 2  ;;  %v1356_v10 = vrot.slane %v1355_v44, 2 }
 0x3b8   :  { %v1361_v20 = vmax.f32 %v3751_v33, %v3289_v25  ;;  %v1276_v52 = vmul.f32 0.03125, %v1171_v59  ;;  %v3317_v13 = vmax.f32 %v1339_v19, %v1340_v34  ;;  %v3752_v62 = vmax.f32 %v3177_v1, %v3173_v57  ;;  %v2519_v59 = vld [vmem:[#allocation2 + $0x198] sm:$0xff] }
 0x3b9   :  { %v3323_v51 = vmul.f32 %v2518_v36, %v1035_v11  ;;  %v1187_v35 = vadd.f32 %v1186_v27, %v1185_v56  ;;  %v1196_v18 = vadd.f32 %v1195_v28, %v1194_v60  ;;  %v1348_v17 = vmax.f32 %v1346_v63, %v1347_v5  ;;  %v1054_v63 = vpop.permute.xlu1 %1053  ;;  %v2521_v27 = vld [vmem:[#allocation2 + $0x1c8] sm:$0xff]  ;;  %v2522_v5 = vld [vmem:[#allocation2 + $0x160] sm:$0xff]  ;;  %v2524_v36 = vld [vmem:[#allocation2 + $0x130] sm:$0xff] }
 0x3ba   :  { %v1370_v7 = vmax.f32 %v3752_v62, %v3291_v29  ;;  %v1357_v38 = vmax.f32 %v1355_v44, %v1356_v10  ;;  %v3325_v16 = vmul.f32 0.03125, %v1180_v23  ;;  %v3329_v30 = vsel %vm529_vm4, %v1276_v52, %v3258_v37  ;;  %v2523_v52 = vld [vmem:[#allocation2 + $0x168] sm:$0xff] }
 0x3bb   :  { %v3333_v34 = vsel %vm529_vm4, %v1332_v4, %v3264_v45  ;;  %v3335_v19 = vmul.f32 %v2519_v59, %v1035_v11  ;;  %v1188_v47 = vrot.slane %v1187_v35, 1  ;;  %v1197_v21 = vrot.slane %v1196_v18, 1  ;;  %v2520_v4 = vld [vmem:[#allocation2 + $0x1c0] sm:$0xff]  ;;  %v2525_v45 = vld [vmem:[#allocation2 + $0x138] sm:$0xff] }
 0x3bc   :  { %v1349_v41 = vrot.slane %v1348_v17, 1  ;;  %v1358_v56 = vrot.slane %v1357_v38, 1  ;;  %v3339_v60 = vadd.f32 %v3323_v51, %v3285_v48  ;;  %v3349_v33 = vmul.f32 %v2520_v4, %v1050_v22 }
 0x3bd   :  { %v3343_v37 = vadd.f32 %v3335_v19, %v3287_v12  ;;  %v1189_v44 = vadd.f32 %v1188_v47, %v1187_v35  ;;  %v1198_v23 = vadd.f32 %v1197_v21, %v1196_v18  ;;  %v3351_v28 = vmul.f32 %v2521_v27, %v1050_v22  ;;  %v2526_v47 = vld [vmem:[#allocation2 + $0x1d0] sm:$0xff]  ;;  %v2527_v22 = vld [vmem:[#allocation2 + $0x1d8] sm:$0xff] }
 0x3be   :  { %3753 = vst [vmem:[#allocation50_spill] sm:$0xff] %v3349_v33  ;;  %v3353_v10 = vmul.f32 %v2522_v5, %v1020_v26  ;;  %v3355_v62 = vmul.f32 %v2523_v52, %v1020_v26  ;;  %v3357_v59 = vmul.f32 %v2524_v36, %v1005_v42  ;;  %v3359_v29 = vmul.f32 %v2525_v45, %v1005_v42  ;;  %v1039_v45 = vpop.permute.xlu1 %1038 }
 0x3bf   :  { %3754 = vst [vmem:[#allocation51_spill] sm:$0xff] %v3351_v28  ;;  %v3361_v35 = vmax.f32 %v1348_v17, %v1349_v41  ;;  %v3363_v18 = vmax.f32 %v1357_v38, %v1358_v56  ;;  %v3365_v21 = vmul.f32 %v2526_v47, %v1054_v63  ;;  %v3367_v4 = vmul.f32 %v2527_v22, %v1054_v63  ;;  %v1024_v63 = vpop.permute.xlu0 %1023  ;;  %v2528_v47 = vld [vmem:[#allocation2 + $0x170] sm:$0xff] }
 0x3c0   :  { %3755 = vst [vmem:[#allocation52_spill] sm:$0xff] %v3353_v10  ;;  %3756 = vst [vmem:[#allocation53_spill] sm:$0xff] %v3355_v62  ;;  %v3369_v27 = vmul.f32 0.03125, %v1189_v44  ;;  %v3371_v26 = vmul.f32 0.03125, %v1198_v23  ;;  %v1218_v5 = vadd.f32 %v3279_v31, %v3353_v10  ;;  %v1227_v42 = vadd.f32 %v3283_v50, %v3355_v62 }
 0x3c1   :  { %3757 = vst [vmem:[#allocation54_spill] sm:$0xff] %v3357_v59  ;;  %3758 = vst [vmem:[#allocation55_spill] sm:$0xff] %v3359_v29  ;;  %v1201_v17 = vadd.f32 %v3303_v24, %v3357_v59  ;;  %v1210_v38 = vadd.f32 %v3307_v40, %v3359_v29  ;;  %v1362_v41 = vmax.f32 %v1361_v20, %v3357_v59 }
 0x3c2   :  { %3759 = vst [vmem:[#allocation56_spill] sm:$0xff] %v3365_v21  ;;  %3760 = vst [vmem:[#allocation57_spill] sm:$0xff] %v3367_v4  ;;  %v1371_v56 = vmax.f32 %v1370_v7, %v3359_v29  ;;  %v3761_v44 = vmax.f32 %v3229_v6, %v3253_v32  ;;  %v3762_v50 = vmax.f32 %v3231_v0, %v3255_v2 }
 0x3c3   :  { %v3393_v24 = vadd.f32 %v3365_v21, %v3349_v33  ;;  %v3397_v40 = vadd.f32 %v3367_v4, %v3351_v28  ;;  %v1202_v20 = vrot.slane %v1201_v17, 4  ;;  %v1211_v7 = vrot.slane %v1210_v38, 4 }
 0x3c4   :  { %v1379_v31 = vmax.f32 %v3761_v44, %v3353_v10  ;;  %v1388_v23 = vmax.f32 %v3762_v50, %v3355_v62  ;;  %v1363_v52 = vrot.slane %v1362_v41, 4  ;;  %v1372_v36 = vrot.slane %v1371_v56, 4  ;;  %v2529_v44 = vld [vmem:[#allocation2 + $0x178] sm:$0xff]  ;;  %v2530_v10 = vld [vmem:[#allocation2 + $0x1a0] sm:$0xff]  ;;  %v2531_v62 = vld [vmem:[#allocation2 + $0x1a8] sm:$0xff] }
 0x3c5   :  { %v3399_v22 = vmul.f32 %v2528_v47, %v1024_v63  ;;  %v3401_v11 = vmul.f32 %v2529_v44, %v1024_v63  ;;  %v3403_v50 = vmul.f32 %v2530_v10, %v1039_v45  ;;  %v3405_v2 = vmul.f32 %v2531_v62, %v1039_v45 }
 0x3c6   :  { %v1203_v32 = vadd.f32 %v1202_v20, %v1201_v17  ;;  %v1212_v0 = vadd.f32 %v1211_v7, %v1210_v38  ;;  %v1364_v6 = vmax.f32 %v1362_v41, %v1363_v52  ;;  %v1373_v29 = vmax.f32 %v1371_v56, %v1372_v36 }
 0x3c7   :  { %3763 = vst [vmem:[#allocation58_spill] sm:$0xff] %v3399_v22  ;;  %3764 = vst [vmem:[#allocation59_spill] sm:$0xff] %v3401_v11  ;;  %v1219_v59 = vadd.f32 %v1218_v5, %v3399_v22  ;;  %v1228_v25 = vadd.f32 %v1227_v42, %v3401_v11  ;;  %v1380_v47 = vmax.f32 %v1379_v31, %v3399_v22 }
 0x3c8   :  { %v1389_v57 = vmax.f32 %v1388_v23, %v3401_v11  ;;  %v1204_v63 = vrot.slane %v1203_v32, 2  ;;  %v1213_v44 = vrot.slane %v1212_v0, 2  ;;  %v1365_v58 = vrot.slane %v1364_v6, 2 }
 0x3c9   :  { %v1374_v10 = vrot.slane %v1373_v29, 2  ;;  %v1220_v1 = vrot.slane %v1219_v59, 4  ;;  %v1229_v61 = vrot.slane %v1228_v25, 4  ;;  %v1381_v62 = vrot.slane %v1380_v47, 4 }
 0x3ca   :  { %v1390_v45 = vrot.slane %v1389_v57, 4  ;;  %v1205_v17 = vadd.f32 %v1204_v63, %v1203_v32  ;;  %v1214_v38 = vadd.f32 %v1213_v44, %v1212_v0  ;;  %v1366_v41 = vmax.f32 %v1364_v6, %v1365_v58  ;;  %v1043_v0 = vpop.permute.xlu0 %1042  ;;  %v1058_v63 = vpop.permute.xlu1 %1057 }
 0x3cb   :  { %v1375_v56 = vmax.f32 %v1373_v29, %v1374_v10  ;;  %v1221_v20 = vadd.f32 %v1220_v1, %v1219_v59  ;;  %v1230_v5 = vadd.f32 %v1229_v61, %v1228_v25  ;;  %v1382_v7 = vmax.f32 %v1380_v47, %v1381_v62 }
 0x3cc   :  { %v1391_v42 = vmax.f32 %v1389_v57, %v1390_v45  ;;  %v1206_v52 = vrot.slane %v1205_v17, 1  ;;  %v1215_v31 = vrot.slane %v1214_v38, 1  ;;  %v1367_v36 = vrot.slane %v1366_v41, 1 }
 0x3cd   :  { %v1376_v23 = vrot.slane %v1375_v56, 1  ;;  %v1222_v11 = vrot.slane %v1221_v20, 2  ;;  %v1231_v22 = vrot.slane %v1230_v5, 2  ;;  %v1383_v14 = vrot.slane %v1382_v7, 2 }
 0x3ce   :  { %v1392_v53 = vrot.slane %v1391_v42, 2  ;;  %v1207_v55 = vadd.f32 %v1206_v52, %v1205_v17  ;;  %v1216_v49 = vadd.f32 %v1215_v31, %v1214_v38  ;;  %v1414_v32 = vmax.f32 %v3349_v33, %v3365_v21  ;;  %v2532_v17 = vld [vmem:[#allocation2 + $0x1b0] sm:$0xff]  ;;  %v2533_v38 = vld [vmem:[#allocation2 + $0x1b8] sm:$0xff] }
 0x3cf   :  { %v1423_v58 = vmax.f32 %v3351_v28, %v3367_v4  ;;  %v1223_v1 = vadd.f32 %v1222_v11, %v1221_v20  ;;  %v1232_v61 = vadd.f32 %v1231_v22, %v1230_v5  ;;  %v1384_v6 = vmax.f32 %v1382_v7, %v1383_v14 }
 0x3d0   :  { %v1393_v57 = vmax.f32 %v1391_v42, %v1392_v53  ;;  %v3415_v25 = vmax.f32 %v1366_v41, %v1367_v36  ;;  %v3417_v29 = vmax.f32 %v1375_v56, %v1376_v23  ;;  %v1236_v59 = vadd.f32 %v3339_v60, %v3403_v50 }
 0x3d1   :  { %v1245_v47 = vadd.f32 %v3343_v37, %v3405_v2  ;;  %v1224_v44 = vrot.slane %v1223_v1, 1  ;;  %v1233_v10 = vrot.slane %v1232_v61, 1  ;;  %v1385_v62 = vrot.slane %v1384_v6, 1 }
 0x3d2   :  { %v1394_v45 = vrot.slane %v1393_v57, 1  ;;  %v3765_v53 = vmax.f32 %v3285_v48, %v3323_v51  ;;  %v3766_v11 = vmax.f32 %v3287_v12, %v3335_v19  ;;  %v3431_v60 = vmul.f32 %v2532_v17, %v1043_v0 }
 0x3d3   :  { %v3433_v37 = vmul.f32 %v2533_v38, %v1043_v0  ;;  %v3435_v41 = vmul.f32 0.03125, %v1207_v55  ;;  %v3437_v56 = vmul.f32 0.03125, %v1216_v49  ;;  %v1225_v20 = vadd.f32 %v1224_v44, %v1223_v1  ;;  %v2534_v0 = vld [vmem:[#allocation2 + $0x1e0] sm:$0xff]  ;;  %v2535_v55 = vld [vmem:[#allocation2 + $0x1e8] sm:$0xff]  ;;  %v2536_v38 = vld [vmem:[#allocation2 + $0x1f0] sm:$0xff] }
 0x3d4   :  { %v1397_v14 = vmax.f32 %v3765_v53, %v3403_v50  ;;  %v1406_v22 = vmax.f32 %v3766_v11, %v3405_v2  ;;  %v1234_v5 = vadd.f32 %v1233_v10, %v1232_v61  ;;  %v1237_v7 = vadd.f32 %v1236_v59, %v3431_v60  ;;  %v1062_v10 = vpop.permute.xlu1 %1061 }
 0x3d5   :  { %3767 = vst [vmem:[#allocation60_spill] sm:$0xff] %v3433_v37  ;;  %v1246_v42 = vadd.f32 %v1245_v47, %v3433_v37  ;;  %v3443_v36 = vmax.f32 %v1384_v6, %v1385_v62  ;;  %v3445_v23 = vmax.f32 %v1393_v57, %v1394_v45  ;;  %v3447_v53 = vmul.f32 %v2534_v0, %v1058_v63 }
 0x3d6   :  { %v1398_v52 = vmax.f32 %v1397_v14, %v3431_v60  ;;  %v1407_v31 = vmax.f32 %v1406_v22, %v3433_v37  ;;  %v3449_v49 = vmul.f32 %v2535_v55, %v1058_v63  ;;  %v1238_v1 = vrot.slane %v1237_v7, 4 }
 0x3d7   :  { %3768 = vst [vmem:[#allocation61_spill] sm:$0xff] %v3447_v53  ;;  %v1247_v61 = vrot.slane %v1246_v42, 4  ;;  %v3451_v47 = vmul.f32 0.03125, %v1225_v20  ;;  %v3453_v14 = vmul.f32 0.03125, %v1234_v5  ;;  %v1254_v6 = vadd.f32 %v3393_v24, %v3447_v53  ;;  %v2537_v20 = vld [vmem:[#allocation2 + $0x1f8] sm:$0xff] }
 0x3d8   :  { %3769 = vst [vmem:[#allocation62_spill] sm:$0xff] %v3449_v49  ;;  %v1399_v44 = vrot.slane %v1398_v52, 4  ;;  %v1408_v59 = vrot.slane %v1407_v31, 4  ;;  %v1263_v57 = vadd.f32 %v3397_v40, %v3449_v49  ;;  %v1239_v62 = vadd.f32 %v1238_v1, %v1237_v7 }
 0x3d9   :  { %v1248_v45 = vadd.f32 %v1247_v61, %v1246_v42  ;;  %v1415_v22 = vmax.f32 %v1414_v32, %v3447_v53  ;;  %v1424_v17 = vmax.f32 %v1423_v58, %v3449_v49  ;;  %v3461_v0 = vmul.f32 %v2536_v38, %v1062_v10 }
 0x3da   :  { %v1400_v11 = vmax.f32 %v1398_v52, %v1399_v44  ;;  %v1409_v63 = vmax.f32 %v1407_v31, %v1408_v59  ;;  %v3463_v5 = vmul.f32 %v2537_v20, %v1062_v10  ;;  %v1240_v55 = vrot.slane %v1239_v62, 2 }
 0x3db   :  { %v1249_v4 = vrot.slane %v1248_v45, 2  ;;  %v1255_v40 = vadd.f32 %v1254_v6, %v3461_v0  ;;  %v1416_v42 = vmax.f32 %v1415_v22, %v3461_v0 }
 0x3dc   :  { %v1401_v24 = vrot.slane %v1400_v11, 2  ;;  %v1410_v21 = vrot.slane %v1409_v63, 2  ;;  %v1264_v7 = vadd.f32 %v1263_v57, %v3463_v5  ;;  %v1425_v32 = vmax.f32 %v1424_v17, %v3463_v5 }
 0x3dd   :  { %v1241_v52 = vadd.f32 %v1240_v55, %v1239_v62  ;;  %v1250_v58 = vadd.f32 %v1249_v4, %v1248_v45  ;;  %v1256_v61 = vrot.slane %v1255_v40, 4  ;;  %v1417_v59 = vrot.slane %v1416_v42, 4 }
 0x3de   :  { %v1402_v31 = vmax.f32 %v1400_v11, %v1401_v24  ;;  %v1411_v1 = vmax.f32 %v1409_v63, %v1410_v21  ;;  %v1265_v44 = vrot.slane %v1264_v7, 4  ;;  %v1426_v10 = vrot.slane %v1425_v32, 4 }
 0x3df   :  { %v1242_v38 = vrot.slane %v1241_v52, 1  ;;  %v1251_v20 = vrot.slane %v1250_v58, 1  ;;  %v1257_v28 = vadd.f32 %v1256_v61, %v1255_v40  ;;  %v1418_v33 = vmax.f32 %v1416_v42, %v1417_v59 }
 0x3e0   :  { %v1403_v49 = vrot.slane %v1402_v31, 1  ;;  %v1412_v53 = vrot.slane %v1411_v1, 1  ;;  %v1266_v6 = vadd.f32 %v1265_v44, %v1264_v7  ;;  %v1427_v57 = vmax.f32 %v1425_v32, %v1426_v10 }
 0x3e1   :  { %v1243_v37 = vadd.f32 %v1242_v38, %v1241_v52  ;;  %v1252_v22 = vadd.f32 %v1251_v20, %v1250_v58  ;;  %v1488_v4 = vsel %vm529_vm4, %v3317_v13, %v3267_v46  ;;  %v1482_v21 = vsel %vm531_vm5, %v3361_v35, %v3333_v34 }
 0x3e2   :  { %v1258_v62 = vrot.slane %v1257_v28, 2  ;;  %v1267_v45 = vrot.slane %v1266_v6, 2  ;;  %v1419_v11 = vrot.slane %v1418_v33, 2  ;;  %v1428_v63 = vrot.slane %v1427_v57, 2 }
 0x3e3   :  { %v1404_v17 = vmax.f32 %v1402_v31, %v1403_v49  ;;  %v1413_v55 = vmax.f32 %v1411_v1, %v1412_v53  ;;  %v1489_v24 = vsel %vm531_vm5, %v3363_v18, %v1488_v4  ;;  %v1483_v40 = vsel %vm533_vm6, %v3415_v25, %v1482_v21 }
 0x3e4   :  { %v1259_v7 = vadd.f32 %v1258_v62, %v1257_v28  ;;  %v1268_v42 = vadd.f32 %v1267_v45, %v1266_v6  ;;  %v1420_v32 = vmax.f32 %v1418_v33, %v1419_v11  ;;  %v1429_v46 = vmax.f32 %v1427_v57, %v1428_v63 }
 0x3e5   :  { %v1284_v13 = vmul.f32 0.03125, %v1243_v37  ;;  %v1490_v34 = vsel %vm533_vm6, %v3417_v29, %v1489_v24  ;;  %v1484_v35 = vsel %vm535_vm7, %v3443_v36, %v1483_v40  ;;  %v1285_v52 = vmul.f32 0.03125, %v1252_v22 }
 0x3e6   :  { %v1260_v49 = vrot.slane %v1259_v7, 1  ;;  %v1269_v53 = vrot.slane %v1268_v42, 1  ;;  %v1421_v58 = vrot.slane %v1420_v32, 1  ;;  %v1430_v31 = vrot.slane %v1429_v46, 1 }
 0x3e7   :  { %v1491_v18 = vsel %vm535_vm7, %v3445_v23, %v1490_v34  ;;  %v1485_v28 = vsel %vm537_vm8, %v1404_v17, %v1484_v35  ;;  %v1456_v33 = vsel %vm529_vm4, %v3325_v16, %v3261_v3  ;;  %v1450_v25 = vsel %vm531_vm5, %v3369_v27, %v3329_v30 }
 0x3e8   :  { %v1261_v29 = vadd.f32 %v1260_v49, %v1259_v7  ;;  %v1422_v37 = vmax.f32 %v1420_v32, %v1421_v58  ;;  %v1431_v36 = vmax.f32 %v1429_v46, %v1430_v31  ;;  %v1457_v1 = vsel %vm531_vm5, %v3371_v26, %v1456_v33 }
 0x3e9   :  { %v1492_v61 = vsel %vm537_vm8, %v1413_v55, %v1491_v18  ;;  %v1270_v44 = vadd.f32 %v1269_v53, %v1268_v42  ;;  %v1458_v23 = vsel %vm533_vm6, %v3437_v56, %v1457_v1  ;;  %v1451_v59 = vsel %vm533_vm6, %v3435_v41, %v1450_v25 }
 0x3ea   :  { %v1286_v3 = vmul.f32 0.03125, %v1261_v29  ;;  %v1493_v16 = vsel %vm539_vm9, %v1431_v36, %v1492_v61  ;;  %v1486_v30 = vsel %vm539_vm9, %v1422_v37, %v1485_v28  ;;  %v1452_v27 = vsel %vm535_vm7, %v3451_v47, %v1451_v59 }
 0x3eb   :  { %v1499_v10 = vpack.c.bf16 %v1493_v16, %v1493_v16  ;;  %v1498_v38 = vpack.c.bf16 %v1486_v30, %v1486_v30  ;;  %v1287_v26 = vmul.f32 0.03125, %v1270_v44  ;;  %v1459_v20 = vsel %vm535_vm7, %v3453_v14, %v1458_v23 }
 0x3ec   :  { %v1460_v6 = vsel %vm537_vm8, %v1285_v52, %v1459_v20  ;;  %v1453_v56 = vsel %vm537_vm8, %v1284_v13, %v1452_v27  ;;  %v2616_v52 = vmov 1966171168  }
 0x3ed   :  { %1957 = vmatprep.mubr.bf16.mxu1 %v1499_v10  ;;  %v1461_v41 = vsel %vm539_vm9, %v1287_v26, %v1460_v6  ;;  %v1454_v57 = vsel %vm539_vm9, %v1286_v3, %v1453_v56  ;;  %v1981_v49 = vunpack.c.l.s4 %v2616_v52 }
 0x3ee   :  { %1958 = vmatmul.mubr.bf16.vlgmr.msra.gmra.mrb[4].mxu1 %v1498_v38  ;;  %v1497_v22 = vpack.c.bf16 %v1461_v41, %v1461_v41  ;;  %v1496_v4 = vpack.c.bf16 %v1454_v57, %v1454_v57 }
 0x3ef   :  { %v1982_v53 = vunpack.c.0.s8 %v1981_v49  ;;  %v3778_v49 = vld [vmem:[#allocation13_spill] sm:$0xff] }
 0x3f0   :  { %1916 = vmatprep.mubr.bf16.mxu0 %v1497_v22 }
 0x3f1   :  { %1917 = vmatmul.mubr.bf16.vlgmr.msra.gmra.mrb[4].mxu0 %v1496_v4  ;;  %v1985_v31 = vsub.s32 %v1982_v53, %v2882_v8  ;;  %v3779_v53 = vld [vmem:[#allocation22_spill] sm:$0xff] }
 0x4c1   :  { %v1959_v47 = vpop.f32.mrb[4].mxu1 }
 0x4c2   :  { %v1961_v21 = vpop.f32.mrb[5].mxu1 }
 0x4c3   :  { %v1963_v62 = vpop.f32.mrb[6].mxu1 }
 0x4c4   :  { %v1918_v45 = vpop.f32.mrb[4].mxu0  ;;  %v1964_v11 = vpop.f32.mrb[7].mxu1 }
 0x4c5   :  { %v1960_v14 = vadd.f32 %v1959_v47, %v1918_v45  ;;  %v1920_v63 = vpop.f32.mrb[5].mxu0 }
 0x4c6   :  { %v1962_v17 = vadd.f32 %v1961_v21, %v1920_v63  ;;  %v1922_v55 = vpop.f32.mrb[6].mxu0 }
 0x4c7   :  { %v1966_v24 = vsub.f32 0.0, %v1960_v14  ;;  %v1923_v40 = vpop.f32.mrb[7].mxu0 }
 0x4c8   :  { %v1967_v7 = vsub.f32 0.0, %v1962_v17  ;;  %v3770_v17 = vld [vmem:[#allocation11_spill] sm:$0xff] }
 0x4c9   :  { %v1968_v42 = vmul.f32 1.442695, %v1966_v24  ;;  %v3771_v24 = vld [vmem:[#allocation14_spill] sm:$0xff] }
 0x4ca   :  { %v1970_v32 = vmul.f32 1.442695, %v1967_v7  ;;  %v3772_v7 = vld [vmem:[#allocation15_spill] sm:$0xff] }
 0x4cb   :  { %2466 = vpow2.f32 %v1968_v42 }
 0x4cc   :  { %2468 = vpow2.f32 %v1970_v32  ;;  %v3773_v32 = vld [vmem:[#allocation36_spill] sm:$0xff] }
 0x4d5   :  { %v2467_v46 = vpop.eup %2466 }
 0x4d6   :  { %v2469_v13 = vpop.eup %2468  ;;  %v1972_v34 = vadd.f32 1.0, %v2467_v46 }
 0x4d7   :  { %v1973_v35 = vadd.f32 1.0, %v2469_v13  ;;  %v3774_v13 = vld [vmem:[#allocation37_spill] sm:$0xff] }
 0x4d8   :  { %2470 = vrcp.f32 %v1972_v34  ;;  %v3775_v34 = vld [vmem:[#allocation16_spill] sm:$0xff] }
 0x4d9   :  { %2472 = vrcp.f32 %v1973_v35 }
 0x4e2   :  { %v2471_v58 = vpop.eup %2470 }
 0x4e3   :  { %v2473_v18 = vpop.eup %2472 }
 0x4e4   :  { %v1978_v28 = vcombine.low %v2471_v58, %v2473_v18  ;;  %v1979_v33 = vcombine.high %v2471_v58, %v2473_v18 }
 0x4e6   :  { %v1986_v25 = vrot.slane %v1978_v28, %v1985_v31  ;;  %v1993_v29 = vrot.slane %v1979_v33, %v1985_v31  ;;  %v3781_v28 = vld [vmem:[#allocation34_spill] sm:$0xff] }
 0x4e8   :  { %v1994_v37 = vcombine.high %v1986_v25, %v1986_v25  ;;  %v1995_v36 = vcombine.high %v1993_v29, %v1993_v29  ;;  %v2002_v1 = vrot.slane %v1986_v25, %v1985_v31  ;;  %v2009_v61 = vrot.slane %v1993_v29, %v1985_v31  ;;  %v3782_v25 = vld [vmem:[#allocation35_spill] sm:$0xff] }
 0x4ea   :  { %v2016_v44 = vrot.slane %v1994_v37, %v1985_v31  ;;  %v2023_v23 = vrot.slane %v1995_v36, %v1985_v31  ;;  %v2024_v59 = vcombine.high %v2002_v1, %v2002_v1  ;;  %v2025_v3 = vcombine.high %v2009_v61, %v2009_v61  ;;  %v3780_v31 = vld [vmem:[#allocation23_spill] sm:$0xff]  ;;  %v3783_v37 = vld [vmem:[#allocation18_spill] sm:$0xff] }
 0x4eb   :  { %v2031_v16 = vrot.slane %v2002_v1, %v3058_v9  ;;  %v2035_v30 = vrot.slane %v2002_v1, %v3065_v15  ;;  %v3513_v27 = vrot.slane %v2009_v61, %v3058_v9  ;;  %v3516_v8 = vrot.slane %v2009_v61, %v3065_v15  ;;  %v3784_v1 = vld [vmem:[#allocation19_spill] sm:$0xff] }
 0x4ec   :  { %v2026_v10 = vcombine.high %v2016_v44, %v2016_v44  ;;  %v2027_v38 = vcombine.high %v2023_v23, %v2023_v23  ;;  %v2039_v26 = vrot.slane %v2016_v44, %v3058_v9  ;;  %v2043_v20 = vrot.slane %v2016_v44, %v3065_v15  ;;  %v3785_v44 = vld [vmem:[#allocation20_spill] sm:$0xff] }
 0x4ed   :  { %v2047_v6 = vrot.slane %v2024_v59, %v3058_v9  ;;  %v2051_v56 = vrot.slane %v2024_v59, %v3065_v15  ;;  %v3523_v41 = vrot.slane %v2023_v23, %v3058_v9  ;;  %v3526_v57 = vrot.slane %v2023_v23, %v3065_v15  ;;  %v3786_v59 = vld [vmem:[#allocation21_spill] sm:$0xff] }
 0x4ee   :  { %v2055_v22 = vrot.slane %v2026_v10, %v3058_v9  ;;  %v2059_v4 = vrot.slane %v2026_v10, %v3065_v15  ;;  %v3531_v47 = vrot.slane %v2025_v3, %v3058_v9  ;;  %v3534_v21 = vrot.slane %v2025_v3, %v3065_v15  ;;  %v3788_v10 = vld [vmem:[#allocation25_spill] sm:$0xff] }
 0x4ef   :  { %v3537_v62 = vrot.slane %v2027_v38, %v3058_v9  ;;  %v3540_v45 = vrot.slane %v2027_v38, %v3065_v15  ;;  %v2108_v11 = vmul.f32 %v2031_v16, %v3085_v54  ;;  %v2109_v14 = vmul.f32 %v2035_v30, %v3087_v43  ;;  %v3776_v15 = vld [vmem:[#allocation17_spill] sm:$0xff]  ;;  %v3777_v54 = vld [vmem:[#allocation12_spill] sm:$0xff] }
 0x4f0   :  { %v2110_v63 = vmul.f32 %v2031_v16, %v3081_v39  ;;  %v2111_v55 = vmul.f32 %v2035_v30, %v3770_v17  ;;  %v2112_v40 = vmul.f32 %v2031_v16, %v3771_v24  ;;  %v2113_v42 = vmul.f32 %v2035_v30, %v3772_v7 }
 0x4f1   :  { %v2114_v46 = vmul.f32 %v2031_v16, %v3773_v32  ;;  %v2115_v9 = vmul.f32 %v2035_v30, %v3774_v13  ;;  %v2116_v35 = vmul.f32 %v2039_v26, %v3775_v34  ;;  %v2117_v52 = vmul.f32 %v2043_v20, %v3776_v15  ;;  %2172 = vst [vmem:[#allocation7] sm:$0xff] %v2108_v11  ;;  %v3787_v16 = vld [vmem:[#allocation24_spill] sm:$0xff]  ;;  %v3790_v11 = vld [vmem:[#allocation43_spill] sm:$0xff] }
 0x4f2   :  { %2173 = vst [vmem:[#allocation7 + $0x8] sm:$0xff] %v2109_v14  ;;  %v2118_v43 = vmul.f32 %v2039_v26, %v3777_v54  ;;  %v2119_v39 = vmul.f32 %v2043_v20, %v3778_v49  ;;  %v2120_v58 = vmul.f32 %v2039_v26, %v3779_v53  ;;  %v2121_v18 = vmul.f32 %v2043_v20, %v3780_v31 }
 0x4f3   :  { %2174 = vst [vmem:[#allocation7 + $0x10] sm:$0xff] %v2110_v63  ;;  %2175 = vst [vmem:[#allocation7 + $0x18] sm:$0xff] %v2111_v55  ;;  %v2122_v33 = vmul.f32 %v2039_v26, %v3781_v28  ;;  %v2123_v29 = vmul.f32 %v2043_v20, %v3782_v25  ;;  %v2124_v36 = vmul.f32 %v2047_v6, %v3783_v37  ;;  %v3789_v26 = vld [vmem:[#allocation42_spill] sm:$0xff]  ;;  %v3792_v55 = vld [vmem:[#allocation27_spill] sm:$0xff] }
 0x4f4   :  { %2176 = vst [vmem:[#allocation7 + $0x20] sm:$0xff] %v2112_v40  ;;  %2177 = vst [vmem:[#allocation7 + $0x28] sm:$0xff] %v2113_v42  ;;  %v2125_v61 = vmul.f32 %v2051_v56, %v3784_v1  ;;  %v2126_v23 = vmul.f32 %v2047_v6, %v3785_v44  ;;  %v2127_v3 = vmul.f32 %v2051_v56, %v3786_v59  ;;  %v3791_v63 = vld [vmem:[#allocation26_spill] sm:$0xff]  ;;  %v3793_v40 = vld [vmem:[#allocation28_spill] sm:$0xff] }
 0x4f5   :  { %2178 = vst [vmem:[#allocation7 + $0x30] sm:$0xff] %v2114_v46  ;;  %2179 = vst [vmem:[#allocation7 + $0x38] sm:$0xff] %v2115_v9  ;;  %v2128_v30 = vmul.f32 %v2047_v6, %v3787_v16  ;;  %v2129_v38 = vmul.f32 %v2051_v56, %v3788_v10  ;;  %v2130_v20 = vmul.f32 %v2047_v6, %v3789_v26  ;;  %v3794_v42 = vld [vmem:[#allocation29_spill] sm:$0xff]  ;;  %v3795_v46 = vld [vmem:[#allocation40_spill] sm:$0xff] }
 0x4f6   :  { %2180 = vst [vmem:[#allocation7 + $0x40] sm:$0xff] %v2116_v35  ;;  %2181 = vst [vmem:[#allocation7 + $0x48] sm:$0xff] %v2117_v52  ;;  %v2131_v14 = vmul.f32 %v2051_v56, %v3790_v11  ;;  %v2132_v17 = vmul.f32 %v2055_v22, %v3791_v63  ;;  %v2133_v24 = vmul.f32 %v2059_v4, %v3792_v55  ;;  %v3796_v9 = vld [vmem:[#allocation41_spill] sm:$0xff]  ;;  %v3797_v6 = vld [vmem:[#allocation48_spill] sm:$0xff] }
 0x4f7   :  { %2182 = vst [vmem:[#allocation7 + $0x50] sm:$0xff] %v2118_v43  ;;  %2183 = vst [vmem:[#allocation7 + $0x58] sm:$0xff] %v2119_v39  ;;  %v2134_v7 = vmul.f32 %v2055_v22, %v3793_v40  ;;  %v2135_v32 = vmul.f32 %v2059_v4, %v3794_v42  ;;  %v2136_v13 = vmul.f32 %v2055_v22, %v3795_v46  ;;  %v3798_v35 = vld [vmem:[#allocation49_spill] sm:$0xff]  ;;  %v3799_v52 = vld [vmem:[#allocation32_spill] sm:$0xff] }
 0x4f8   :  { %2184 = vst [vmem:[#allocation7 + $0x60] sm:$0xff] %v2120_v58  ;;  %2185 = vst [vmem:[#allocation7 + $0x68] sm:$0xff] %v2121_v18  ;;  %v2137_v34 = vmul.f32 %v2059_v4, %v3796_v9  ;;  %v2138_v56 = vmul.f32 %v2055_v22, %v3797_v6  ;;  %v2139_v15 = vmul.f32 %v2059_v4, %v3798_v35  ;;  %v3800_v43 = vld [vmem:[#allocation33_spill] sm:$0xff]  ;;  %v3801_v39 = vld [vmem:[#allocation30_spill] sm:$0xff] }
 0x4f9   :  { %2186 = vst [vmem:[#allocation7 + $0x70] sm:$0xff] %v2122_v33  ;;  %2187 = vst [vmem:[#allocation7 + $0x78] sm:$0xff] %v2123_v29  ;;  %v2140_v54 = vmul.f32 %v3513_v27, %v3799_v52  ;;  %v2141_v49 = vmul.f32 %v3516_v8, %v3800_v43  ;;  %v2142_v53 = vmul.f32 %v3513_v27, %v3801_v39  ;;  %v3802_v58 = vld [vmem:[#allocation31_spill] sm:$0xff]  ;;  %v3803_v18 = vld [vmem:[#allocation46_spill] sm:$0xff] }
 0x4fa   :  { %2188 = vst [vmem:[#allocation7 + $0x80] sm:$0xff] %v2124_v36  ;;  %2189 = vst [vmem:[#allocation7 + $0x88] sm:$0xff] %v2125_v61  ;;  %v2143_v31 = vmul.f32 %v3516_v8, %v3802_v58  ;;  %v2144_v22 = vmul.f32 %v3513_v27, %v3803_v18  ;;  %v3804_v4 = vld [vmem:[#allocation47_spill] sm:$0xff]  ;;  %v3805_v33 = vld [vmem:[#allocation54_spill] sm:$0xff]  ;;  %v2157_v63 = vmul.f32 %v3534_v21, %v3287_v12 }
 0x4fb   :  { %2190 = vst [vmem:[#allocation7 + $0x90] sm:$0xff] %v2126_v23  ;;  %2191 = vst [vmem:[#allocation7 + $0x98] sm:$0xff] %v2127_v3  ;;  %v2145_v28 = vmul.f32 %v3516_v8, %v3804_v4  ;;  %v2146_v25 = vmul.f32 %v3513_v27, %v3805_v33  ;;  %v3806_v29 = vld [vmem:[#allocation55_spill] sm:$0xff]  ;;  %v3807_v36 = vld [vmem:[#allocation38_spill] sm:$0xff]  ;;  %v2159_v55 = vmul.f32 %v3534_v21, %v3335_v19 }
 0x4fc   :  { %2192 = vst [vmem:[#allocation7 + $0xa0] sm:$0xff] %v2128_v30  ;;  %2193 = vst [vmem:[#allocation7 + $0xa8] sm:$0xff] %v2129_v38  ;;  %v2147_v37 = vmul.f32 %v3516_v8, %v3806_v29  ;;  %v2148_v1 = vmul.f32 %v3523_v41, %v3807_v36  ;;  %v3808_v61 = vld [vmem:[#allocation39_spill] sm:$0xff]  ;;  %v3809_v23 = vld [vmem:[#allocation44_spill] sm:$0xff]  ;;  %v2171_v9 = vmul.f32 %v3540_v45, %v3463_v5 }
 0x4fd   :  { %2194 = vst [vmem:[#allocation7 + $0xb0] sm:$0xff] %v2130_v20  ;;  %2195 = vst [vmem:[#allocation7 + $0xb8] sm:$0xff] %v2131_v14  ;;  %v2149_v44 = vmul.f32 %v3526_v57, %v3808_v61  ;;  %v2150_v59 = vmul.f32 %v3523_v41, %v3809_v23  ;;  %v3810_v3 = vld [vmem:[#allocation45_spill] sm:$0xff]  ;;  %v3811_v27 = vld [vmem:[#allocation52_spill] sm:$0xff]  ;;  %v2156_v14 = vmul.f32 %v3531_v47, %v3285_v48 }
 0x4fe   :  { %2196 = vst [vmem:[#allocation7 + $0xc0] sm:$0xff] %v2132_v17  ;;  %2197 = vst [vmem:[#allocation7 + $0xc8] sm:$0xff] %v2133_v24  ;;  %v2151_v16 = vmul.f32 %v3526_v57, %v3810_v3  ;;  %v2152_v30 = vmul.f32 %v3523_v41, %v3811_v27  ;;  %v3812_v8 = vld [vmem:[#allocation53_spill] sm:$0xff]  ;;  %v3813_v38 = vld [vmem:[#allocation58_spill] sm:$0xff]  ;;  %v2158_v17 = vmul.f32 %v3531_v47, %v3323_v51 }
 0x4ff   :  { %2198 = vst [vmem:[#allocation7 + $0xd0] sm:$0xff] %v2134_v7  ;;  %2199 = vst [vmem:[#allocation7 + $0xd8] sm:$0xff] %v2135_v32  ;;  %v2153_v10 = vmul.f32 %v3526_v57, %v3812_v8  ;;  %v2154_v26 = vmul.f32 %v3523_v41, %v3813_v38  ;;  %v3814_v20 = vld [vmem:[#allocation59_spill] sm:$0xff]  ;;  %v2160_v41 = vmul.f32 %v3531_v47, %v3403_v50  ;;  %v3815_v12 = vld [vmem:[#allocation60_spill] sm:$0xff] }
 0x500   :  { %2200 = vst [vmem:[#allocation7 + $0xe0] sm:$0xff] %v2136_v13  ;;  %2201 = vst [vmem:[#allocation7 + $0xe8] sm:$0xff] %v2137_v34  ;;  %v2155_v11 = vmul.f32 %v3526_v57, %v3814_v20  ;;  %v2161_v57 = vmul.f32 %v3534_v21, %v3405_v2  ;;  %v2162_v48 = vmul.f32 %v3531_v47, %v3431_v60  ;;  %v3816_v24 = vld [vmem:[#allocation50_spill] sm:$0xff]  ;;  %v3817_v40 = vld [vmem:[#allocation51_spill] sm:$0xff] }
 0x501   :  { %2202 = vst [vmem:[#allocation7 + $0xf0] sm:$0xff] %v2138_v56  ;;  %2203 = vst [vmem:[#allocation7 + $0xf8] sm:$0xff] %v2139_v15  ;;  %v2163_v51 = vmul.f32 %v3534_v21, %v3815_v12  ;;  %v2164_v19 = vmul.f32 %v3537_v62, %v3816_v24  ;;  %v2165_v50 = vmul.f32 %v3540_v45, %v3817_v40  ;;  %v3818_v2 = vld [vmem:[#allocation56_spill] sm:$0xff]  ;;  %v3819_v42 = vld [vmem:[#allocation57_spill] sm:$0xff] }
 0x502   :  { %2204 = vst [vmem:[#allocation7 + $0x100] sm:$0xff] %v2140_v54  ;;  %2205 = vst [vmem:[#allocation7 + $0x108] sm:$0xff] %v2141_v49  ;;  %v2166_v7 = vmul.f32 %v3537_v62, %v3818_v2  ;;  %v2167_v32 = vmul.f32 %v3540_v45, %v3819_v42  ;;  %v3820_v60 = vld [vmem:[#allocation61_spill] sm:$0xff]  ;;  %v3821_v21 = vld [vmem:[#allocation62_spill] sm:$0xff]  ;;  %v2170_v13 = vmul.f32 %v3537_v62, %v3461_v0 }
 0x503   :  { %2206 = vst [vmem:[#allocation7 + $0x110] sm:$0xff] %v2142_v53  ;;  %2207 = vst [vmem:[#allocation7 + $0x118] sm:$0xff] %v2143_v31  ;;  %v2168_v47 = vmul.f32 %v3537_v62, %v3820_v60  ;;  %v2169_v46 = vmul.f32 %v3540_v45, %v3821_v21 }
 0x504   :  { %2208 = vst [vmem:[#allocation7 + $0x120] sm:$0xff] %v2144_v22  ;;  %2209 = vst [vmem:[#allocation7 + $0x128] sm:$0xff] %v2145_v28 }
 0x505   :  { %2210 = vst [vmem:[#allocation7 + $0x130] sm:$0xff] %v2146_v25  ;;  %2211 = vst [vmem:[#allocation7 + $0x138] sm:$0xff] %v2147_v37 }
 0x506   :  { %2212 = vst [vmem:[#allocation7 + $0x140] sm:$0xff] %v2148_v1  ;;  %2213 = vst [vmem:[#allocation7 + $0x148] sm:$0xff] %v2149_v44 }
 0x507   :  { %2214 = vst [vmem:[#allocation7 + $0x150] sm:$0xff] %v2150_v59  ;;  %2215 = vst [vmem:[#allocation7 + $0x158] sm:$0xff] %v2151_v16 }
 0x508   :  { %2216 = vst [vmem:[#allocation7 + $0x160] sm:$0xff] %v2152_v30  ;;  %2217 = vst [vmem:[#allocation7 + $0x168] sm:$0xff] %v2153_v10 }
 0x509   :  { %2218 = vst [vmem:[#allocation7 + $0x170] sm:$0xff] %v2154_v26  ;;  %2219 = vst [vmem:[#allocation7 + $0x178] sm:$0xff] %v2155_v11 }
 0x50a   :  { %2220 = vst [vmem:[#allocation7 + $0x180] sm:$0xff] %v2156_v14  ;;  %2221 = vst [vmem:[#allocation7 + $0x188] sm:$0xff] %v2157_v63 }
 0x50b   :  { %2222 = vst [vmem:[#allocation7 + $0x190] sm:$0xff] %v2158_v17  ;;  %2223 = vst [vmem:[#allocation7 + $0x198] sm:$0xff] %v2159_v55 }
 0x50c   :  { %2224 = vst [vmem:[#allocation7 + $0x1a0] sm:$0xff] %v2160_v41  ;;  %2225 = vst [vmem:[#allocation7 + $0x1a8] sm:$0xff] %v2161_v57 }
 0x50d   :  { %2226 = vst [vmem:[#allocation7 + $0x1b0] sm:$0xff] %v2162_v48  ;;  %2227 = vst [vmem:[#allocation7 + $0x1b8] sm:$0xff] %v2163_v51 }
 0x50e   :  { %2228 = vst [vmem:[#allocation7 + $0x1c0] sm:$0xff] %v2164_v19  ;;  %2229 = vst [vmem:[#allocation7 + $0x1c8] sm:$0xff] %v2165_v50 }
 0x50f   :  { %2230 = vst [vmem:[#allocation7 + $0x1d0] sm:$0xff] %v2166_v7  ;;  %2231 = vst [vmem:[#allocation7 + $0x1d8] sm:$0xff] %v2167_v32 }
 0x510   :  { %2232 = vst [vmem:[#allocation7 + $0x1e0] sm:$0xff] %v2168_v47  ;;  %2233 = vst [vmem:[#allocation7 + $0x1e8] sm:$0xff] %v2169_v46 }
 0x511   :  { %2234 = vst [vmem:[#allocation7 + $0x1f0] sm:$0xff] %v2170_v13  ;;  %2235 = vst [vmem:[#allocation7 + $0x1f8] sm:$0xff] %v2171_v9 }
 0x512   :  { %2593 = shalt.err (!%p2590_p6)
}
 0x513   :  { %s2594_s30 = scalar_lea.hbm %s3657_s4, 8192 }
 0x514   :  { %p2595_p7 = scmp.ne.s32.totalorder %s3657_s4, %s2594_s30  ;;  %p2598_p8 = scmp.lt.u32.totalorder %s2594_s30, %s3657_s4 }
 0x516   :  { %p2600_p9 = pnand %p2598_p8, %p2595_p7 }
 0x518   :  { %2603 = shalt.err (!%p2600_p9)
}
 0x519   :  { %2247 = dma.vmem_to_hbm [thread:$0]  %s2242_s24, 8192, %s3657_s4, [#allocation4], %s2611_s25, %s2611_s25, %s2612_s26  }
 0x51a   :  { %2608 = dma.done.wait [#allocation4], 8192  }
 0x51b   :  { %2609 = vsyncadd [#allocation4], 4294959104 }
 0x51c   :  { %2251 = vsyncpa [#allocation3], 1 }
 0x51d   :  { %2252 = vsyncpa [#allocation6], 1 }
 0x51e   :  { %2253 = vsyncpa [#allocation4], 1 }

</bundles_post_ra>
